<compile_context>
chip_gen: v7x
topology: tpu7x:2x2x1
jax: 0.10.0
libtpu: 0.0.40
codegen_flags: <defaults>
</compile_context>

<pallas_src>
import math
import jax
import jax.numpy as jnp
from jax import lax
from jax.experimental import pallas as pl
from jax.experimental.pallas import tpu as pltpu

# ---- scaled-down hyperparameters (module: 200 / 512 / 8 / 2048 / 33) ----
MAX_N_PARS = 16
H_DIM      = 64
N_HEADS    = 4
HEAD_DIM   = H_DIM // N_HEADS
FF_DIM     = 4 * H_DIM          # TransformerEncoderLayer feed-forward width
N_LABELS   = 33
OUT_PAD    = 128                # lane-dense classifier width (logits padded to 128 lanes)
LN_EPS     = 1e-5

# ---- packed weight-slab layout (bf16, 256 x 256 = 128 KiB) ----
_W_COLS = FF_DIM                 # 256 lanes
_R_QKV  = 0                      # rows   0: 64, cols   0:192  -> wq|wk|wv (scale folded into wq)
_R_W1   = H_DIM                  # rows  64:128, cols   0:256  -> w1
_R_W2T  = 2 * H_DIM              # rows 128:192, cols   0:256  -> w2.T  (contracted trans_b)
_R_MISC = 3 * H_DIM              # rows 192:256, cols   0:128 -> wfc_pad, 128:192 -> wo
_W_ROWS = 4 * H_DIM              # 256

# ---- bias / LayerNorm slab (f32, 16 x 256 = 16 KiB): one padded row each ----
_B_QKV, _B_O, _B_LN1G, _B_LN1B, _B_1, _B_2, _B_LN2G, _B_LN2B, _B_FC = range(9)
_B_ROWS = 16


def echr2_kernel(np_ref, x_ref, w_ref, b_ref, out_ref):
    b = pl.program_id(0)
    num_pars = np_ref[b]                                        # per-case valid length (SMEM)

    x_bf = x_ref[0]                                             # (S, D) bf16
    x = x_bf.astype(jnp.float32)

    # additive key-padding mask, built once per case and broadcast to (S, S)
    key_ids = lax.broadcasted_iota(jnp.int32, (MAX_N_PARS, MAX_N_PARS), 1)
    mask_b = jnp.where(key_ids < num_pars, 0.0, -1e9).astype(jnp.float32)

    # ---------------- fused QKV projection (one MXU pass, N = 3*D) -------------------
    wqkv = w_ref[_R_QKV:_R_QKV + H_DIM, 0:3 * H_DIM]            # (D, 3D) bf16
    bqkv = b_ref[_B_QKV:_B_QKV + 1, 0:3 * H_DIM]                # (1, 3D) f32
    qkv = jnp.dot(x_bf, wqkv, preferred_element_type=jnp.float32) + bqkv
    q = qkv[:, 0:H_DIM]                                         # 1/sqrt(hd) already in wq/bq
    k = qkv[:, H_DIM:2 * H_DIM]
    v = qkv[:, 2 * H_DIM:3 * H_DIM]

    # -------- per-head attention, folded straight into the output projection ---------
    wo = w_ref[_R_MISC:_R_MISC + H_DIM, OUT_PAD:OUT_PAD + H_DIM]  # (D, D) bf16
    attn = jnp.zeros((MAX_N_PARS, H_DIM), jnp.float32)
    for h in range(N_HEADS):                                    # static unroll
        lo = h * HEAD_DIM
        qh = q[:, lo:lo + HEAD_DIM]
        kh = k[:, lo:lo + HEAD_DIM]
        vh = v[:, lo:lo + HEAD_DIM]
        # q @ k^T via dot_general contracting last dims (transpose folded into MXU issue)
        scores = lax.dot_general(qh, kh, (((1,), (1,)), ((), ())),
                                 preferred_element_type=jnp.float32) + mask_b
        m = jnp.max(scores, axis=-1, keepdims=True)
        p = jnp.exp(scores - m)
        denom = jnp.sum(p, axis=-1, keepdims=True)
        p = p * pl.reciprocal(denom, approx=True)               # divide -> EUP slot
        ctx = jnp.dot(p, vh, preferred_element_type=jnp.float32)         # (S, hd)
        attn = attn + jnp.dot(ctx.astype(jnp.bfloat16),
                              wo[lo:lo + HEAD_DIM, :],
                              preferred_element_type=jnp.float32)        # (S, D)
    bo = b_ref[_B_O:_B_O + 1, 0:H_DIM]
    attn = attn + bo

    # ---------------- residual + LayerNorm1 (post-norm) ------------------------------
    y = x + attn
    mu = jnp.mean(y, axis=-1, keepdims=True)
    var = jnp.mean((y - mu) ** 2, axis=-1, keepdims=True)
    ln1g = b_ref[_B_LN1G:_B_LN1G + 1, 0:H_DIM]
    ln1b = b_ref[_B_LN1B:_B_LN1B + 1, 0:H_DIM]
    y = (y - mu) * lax.rsqrt(var + LN_EPS) * ln1g + ln1b

    # ---------------- feed-forward (ReLU) + residual + LayerNorm2 --------------------
    w1 = w_ref[_R_W1:_R_W1 + H_DIM, 0:FF_DIM]                   # (D, FF) bf16
    b1 = b_ref[_B_1:_B_1 + 1, 0:FF_DIM]
    h1 = jnp.maximum(
        jnp.dot(y.astype(jnp.bfloat16), w1, preferred_element_type=jnp.float32) + b1, 0.0)

    w2t = w_ref[_R_W2T:_R_W2T + H_DIM, 0:FF_DIM]                # (D, FF) bf16 = w2.T
    b2 = b_ref[_B_2:_B_2 + 1, 0:H_DIM]
    h2 = lax.dot_general(h1.astype(jnp.bfloat16), w2t, (((1,), (1,)), ((), ())),
                         preferred_element_type=jnp.float32) + b2

    z = y + h2
    mu2 = jnp.mean(z, axis=-1, keepdims=True)
    var2 = jnp.mean((z - mu2) ** 2, axis=-1, keepdims=True)
    ln2g = b_ref[_B_LN2G:_B_LN2G + 1, 0:H_DIM]
    ln2b = b_ref[_B_LN2B:_B_LN2B + 1, 0:H_DIM]
    z = (z - mu2) * lax.rsqrt(var2 + LN_EPS) * ln2g + ln2b

    # ------- MaxPool1d(kernel_size=S) over the padded sequence, fc_out, sigmoid ------
    # (padded rows intentionally participate, matching the PyTorch module)
    pooled = jnp.max(z, axis=0, keepdims=True)                  # (1, D)
    wfc = w_ref[_R_MISC:_R_MISC + H_DIM, 0:OUT_PAD]             # (D, 128) bf16, cols>=33 zero
    bfc = b_ref[_B_FC:_B_FC + 1, 0:OUT_PAD]
    logits = jnp.dot(pooled.astype(jnp.bfloat16), wfc,
                     preferred_element_type=jnp.float32) + bfc
    out_ref[0] = jax.nn.sigmoid(logits)                         # (1, 128) lane-dense


def init_params(key):
    ks = jax.random.split(key, 8)
    std = 0.02
    return {
        "wq": jax.random.normal(ks[0], (H_DIM, H_DIM), jnp.float32) * std,
        "wk": jax.random.normal(ks[1], (H_DIM, H_DIM), jnp.float32) * std,
        "wv": jax.random.normal(ks[2], (H_DIM, H_DIM), jnp.float32) * std,
        "wo": jax.random.normal(ks[3], (H_DIM, H_DIM), jnp.float32) * std,
        "bq": jnp.zeros((1, H_DIM), jnp.float32),
        "bk": jnp.zeros((1, H_DIM), jnp.float32),
        "bv": jnp.zeros((1, H_DIM), jnp.float32),
        "bo": jnp.zeros((1, H_DIM), jnp.float32),
        "ln1g": jnp.ones((1, H_DIM), jnp.float32),
        "ln1b": jnp.zeros((1, H_DIM), jnp.float32),
        "w1": jax.random.normal(ks[4], (H_DIM, FF_DIM), jnp.float32) * std,
        "b1": jnp.zeros((1, FF_DIM), jnp.float32),
        "w2": jax.random.normal(ks[5], (FF_DIM, H_DIM), jnp.float32) * std,
        "b2": jnp.zeros((1, H_DIM), jnp.float32),
        "ln2g": jnp.ones((1, H_DIM), jnp.float32),
        "ln2b": jnp.zeros((1, H_DIM), jnp.float32),
        "wfc": jax.random.normal(ks[6], (H_DIM, N_LABELS), jnp.float32) * std,
        "bfc": jax.random.normal(ks[7], (1, N_LABELS), jnp.float32) * std,
    }


def pack_params(p):
    """Pack the 18 parameter tensors into a bf16 weight slab and an f32 bias/LN slab."""
    def pad_cols(a, width=_W_COLS):
        return jnp.pad(a, ((0, 0), (0, width - a.shape[1])))

    scale = 1.0 / math.sqrt(HEAD_DIM)
    wq = p["wq"] * scale                                        # fold 1/sqrt(hd) into q proj
    bq = p["bq"] * scale

    wqkv = jnp.concatenate([wq, p["wk"], p["wv"]], axis=1)      # (D, 3D)
    band_qkv  = pad_cols(wqkv)                                  # (64, 256)
    band_w1   = p["w1"]                                         # (64, 256)
    band_w2t  = p["w2"].T                                       # (64, 256)  w2 stored transposed
    band_misc = jnp.concatenate(
        [pad_cols(p["wfc"], OUT_PAD),                           # cols   0:128 (33..127 zero)
         p["wo"],                                               # cols 128:192
         jnp.zeros((H_DIM, _W_COLS - OUT_PAD - H_DIM), jnp.float32)], axis=1)
    w_slab = jnp.concatenate([band_qkv, band_w1, band_w2t, band_misc], axis=0)
    assert w_slab.shape == (_W_ROWS, _W_COLS)
    w_slab = w_slab.astype(jnp.bfloat16)                        # bf16 MXU operands, f32 accum

    bqkv = jnp.concatenate([bq, p["bk"], p["bv"]], axis=1)      # (1, 3D)
    rows = [bqkv, p["bo"], p["ln1g"], p["ln1b"], p["b1"], p["b2"],
            p["ln2g"], p["ln2b"], pad_cols(p["bfc"], OUT_PAD)]
    b_rows = [pad_cols(r) for r in rows]
    b_slab = jnp.concatenate(
        b_rows + [jnp.zeros((_B_ROWS - len(b_rows), _W_COLS), jnp.float32)], axis=0)
    assert b_slab.shape == (_B_ROWS, _W_COLS)
    return w_slab, b_slab


def echr2_forward(x_padded, num_pars, w_slab, b_slab):
    """Batched forward.

    x_padded : (B, MAX_N_PARS, H_DIM) stacked+zero-padded BERT pooler outputs.
    num_pars : (B,) int32, number of valid paragraphs per case.
    Returns  : (B, N_LABELS) sigmoid probabilities.
    """
    B = x_padded.shape[0]
    x_bf = x_padded.astype(jnp.bfloat16)

    out = pl.pallas_call(
        echr2_kernel,
        out_shape=jax.ShapeDtypeStruct((B, 1, OUT_PAD), jnp.float32),
        grid_spec=pltpu.PrefetchScalarGridSpec(
            num_scalar_prefetch=1,                              # num_pars -> SMEM
            grid=(B,),
            in_specs=[
                pl.BlockSpec((1, MAX_N_PARS, H_DIM), lambda b, np_ref: (b, 0, 0)),  # x, per case
                pl.BlockSpec((_W_ROWS, _W_COLS),     lambda b, np_ref: (0, 0)),     # weights (resident)
                pl.BlockSpec((_B_ROWS, _W_COLS),     lambda b, np_ref: (0, 0)),     # biases  (resident)
            ],
            out_specs=pl.BlockSpec((1, 1, OUT_PAD), lambda b, np_ref: (b, 0, 0)),
        ),
        compiler_params=pltpu.CompilerParams(
            dimension_semantics=("parallel",)),                 # batch axis -> both TCs on v7x
    )(num_pars, x_bf, w_slab, b_slab)
    return out[:, 0, :N_LABELS]                                 # (B, n_labels)


if __name__ == "__main__":
    key = jax.random.PRNGKey(0)
    k_params, k_x = jax.random.split(key)
    params = init_params(k_params)
    w_slab, b_slab = pack_params(params)

    # a small batch of "cases", each with a different number of paragraphs
    num_pars_list = [10, 16, 3, 7]
    B = len(num_pars_list)
    x_keys = jax.random.split(k_x, B)
    x_padded = jnp.zeros((B, MAX_N_PARS, H_DIM), jnp.float32)
    for i, (kk, n) in enumerate(zip(x_keys, num_pars_list)):
        x_padded = x_padded.at[i, :n].set(jax.random.normal(kk, (n, H_DIM), jnp.float32))
    num_pars = jnp.array(num_pars_list, dtype=jnp.int32)

    out = echr2_forward(x_padded, num_pars, w_slab, b_slab)
    out = jax.block_until_ready(out)

    assert out.shape == (B, N_LABELS)
    assert bool(jnp.all(jnp.isfinite(out)))
    assert bool(jnp.all((out >= 0.0) & (out <= 1.0)))
    print("KERNEL_OK")
</pallas_src>

<mosaic_0001>
module attributes {stable_mosaic.version = 11 : i64} {
  func.func @echr2_kernel(%arg0: i32, %arg1: memref<4xi32, #tpu.memory_space<smem>>, %arg2: memref<1x16x64xbf16, #tpu.memory_space<vmem>>, %arg3: memref<256x256xbf16, #tpu.memory_space<vmem>>, %arg4: memref<16x256xf32, #tpu.memory_space<vmem>>, %arg5: memref<1x1x128xf32, #tpu.memory_space<vmem>>) attributes {dimension_semantics = [#tpu.dimension_semantics<parallel>], iteration_bounds = array<i64: 4>, scalar_prefetch = 1 : i64, scratch_operands = 0 : i64, tpu.core_type = #tpu.core_type<tc>, window_params = [{transform_indices = @transform_0, window_bounds = array<i64: 1, 16, 64>}, {pipeline_mode = #tpu.pipeline_mode<synchronous>, transform_indices = @transform_1, window_bounds = array<i64: 256, 256>}, {pipeline_mode = #tpu.pipeline_mode<synchronous>, transform_indices = @transform_2, window_bounds = array<i64: 16, 256>}, {transform_indices = @transform_3, window_bounds = array<i64: 1, 1, 128>}]} {
    %0 = arith.index_cast %arg0 : i32 to index
    %1 = memref.load %arg1[%0] : memref<4xi32, #tpu.memory_space<smem>>
    %c0 = arith.constant 0 : index
    %c0_0 = arith.constant 0 : index
    %c0_1 = arith.constant 0 : index
    %2 = vector.load %arg2[%c0, %c0_0, %c0_1] : memref<1x16x64xbf16, #tpu.memory_space<vmem>>, vector<1x16x64xbf16>
    %3 = vector.shape_cast %2 : vector<1x16x64xbf16> to vector<16x64xbf16>
    %4 = arith.extf %3 : vector<16x64xbf16> to vector<16x64xf32>
    %5 = tpu.iota {dimensions = array<i32: 1>} : vector<16x16xi32>
    %6 = vector.broadcast %1 : i32 to vector<16x16xi32>
    %7 = arith.cmpi slt, %5, %6 : vector<16x16xi32>
    %cst = arith.constant 0.000000e+00 : f32
    %cst_2 = arith.constant -1.000000e+09 : f32
    %8 = vector.broadcast %cst : f32 to vector<16x16xf32>
    %9 = vector.broadcast %cst_2 : f32 to vector<16x16xf32>
    %10 = arith.select %7, %8, %9 : vector<16x16xi1>, vector<16x16xf32>
    %c0_3 = arith.constant 0 : index
    %c0_4 = arith.constant 0 : index
    %11 = vector.load %arg3[%c0_3, %c0_4] : memref<256x256xbf16, #tpu.memory_space<vmem>>, vector<64x192xbf16>
    %c0_5 = arith.constant 0 : index
    %c0_6 = arith.constant 0 : index
    %12 = vector.load %arg4[%c0_5, %c0_6] : memref<16x256xf32, #tpu.memory_space<vmem>>, vector<1x192xf32>
    %cst_7 = arith.constant dense<0.000000e+00> : vector<16x192xf32>
    %13 = tpu.matmul %3, %11, %cst_7 {dimension_numbers = #tpu.dot_dimension_numbers<[1], [0], [0], [1], [0, 0, 1, 1], [], []>} : vector<16x64xbf16>, vector<64x192xbf16>, vector<16x192xf32> -> vector<16x192xf32>
    %14 = vector.broadcast %12 : vector<1x192xf32> to vector<16x192xf32>
    %15 = arith.addf %13, %14 : vector<16x192xf32>
    %16 = vector.extract_strided_slice %15 {offsets = [0, 0], sizes = [16, 64], strides = [1, 1]} : vector<16x192xf32> to vector<16x64xf32>
    %17 = vector.extract_strided_slice %15 {offsets = [0, 64], sizes = [16, 64], strides = [1, 1]} : vector<16x192xf32> to vector<16x64xf32>
    %18 = vector.extract_strided_slice %15 {offsets = [0, 128], sizes = [16, 64], strides = [1, 1]} : vector<16x192xf32> to vector<16x64xf32>
    %c192 = arith.constant 192 : index
    %c128 = arith.constant 128 : index
    %19 = vector.load %arg3[%c192, %c128] : memref<256x256xbf16, #tpu.memory_space<vmem>>, vector<64x64xbf16>
    %cst_8 = arith.constant 0.000000e+00 : f32
    %20 = vector.broadcast %cst_8 : f32 to vector<16x64xf32>
    %21 = vector.extract_strided_slice %16 {offsets = [0, 0], sizes = [16, 16], strides = [1, 1]} : vector<16x64xf32> to vector<16x16xf32>
    %22 = vector.extract_strided_slice %17 {offsets = [0, 0], sizes = [16, 16], strides = [1, 1]} : vector<16x64xf32> to vector<16x16xf32>
    %23 = vector.extract_strided_slice %18 {offsets = [0, 0], sizes = [16, 16], strides = [1, 1]} : vector<16x64xf32> to vector<16x16xf32>
    %cst_9 = arith.constant dense<0.000000e+00> : vector<16x16xf32>
    %24 = tpu.matmul %21, %22, %cst_9 {dimension_numbers = #tpu.dot_dimension_numbers<[1], [1], [0], [0], [0, 0, 1, 0], [], []>} : vector<16x16xf32>, vector<16x16xf32>, vector<16x16xf32> -> vector<16x16xf32>
    %25 = arith.addf %24, %10 : vector<16x16xf32>
    %cst_10 = arith.constant dense<0xFF800000> : vector<16xf32>
    %26 = vector.multi_reduction <maximumf>, %25, %cst_10 [1] : vector<16x16xf32> to vector<16xf32>
    %27 = vector.shape_cast %26 : vector<16xf32> to vector<16x1xf32>
    %28 = vector.broadcast %27 : vector<16x1xf32> to vector<16x16xf32>
    %29 = arith.subf %25, %28 : vector<16x16xf32>
    %30 = math.exp %29 : vector<16x16xf32>
    %cst_11 = arith.constant dense<0.000000e+00> : vector<16xf32>
    %31 = vector.multi_reduction <add>, %30, %cst_11 [1] : vector<16x16xf32> to vector<16xf32>
    %32 = vector.shape_cast %31 : vector<16xf32> to vector<16x1xf32>
    %33 = tpu.reciprocal %32 {approx = true} : vector<16x1xf32> -> vector<16x1xf32>
    %34 = vector.broadcast %33 : vector<16x1xf32> to vector<16x16xf32>
    %35 = arith.mulf %30, %34 : vector<16x16xf32>
    %cst_12 = arith.constant dense<0.000000e+00> : vector<16x16xf32>
    %36 = tpu.matmul %35, %23, %cst_12 {dimension_numbers = #tpu.dot_dimension_numbers<[1], [0], [0], [1], [0, 0, 1, 1], [], []>} : vector<16x16xf32>, vector<16x16xf32>, vector<16x16xf32> -> vector<16x16xf32>
    %37 = arith.truncf %36 : vector<16x16xf32> to vector<16x16xbf16>
    %38 = vector.extract_strided_slice %19 {offsets = [0, 0], sizes = [16, 64], strides = [1, 1]} : vector<64x64xbf16> to vector<16x64xbf16>
    %cst_13 = arith.constant dense<0.000000e+00> : vector<16x64xf32>
    %39 = tpu.matmul %37, %38, %cst_13 {dimension_numbers = #tpu.dot_dimension_numbers<[1], [0], [0], [1], [0, 0, 1, 1], [], []>} : vector<16x16xbf16>, vector<16x64xbf16>, vector<16x64xf32> -> vector<16x64xf32>
    %40 = arith.addf %20, %39 : vector<16x64xf32>
    %41 = vector.extract_strided_slice %16 {offsets = [0, 16], sizes = [16, 16], strides = [1, 1]} : vector<16x64xf32> to vector<16x16xf32>
    %42 = vector.extract_strided_slice %17 {offsets = [0, 16], sizes = [16, 16], strides = [1, 1]} : vector<16x64xf32> to vector<16x16xf32>
    %43 = vector.extract_strided_slice %18 {offsets = [0, 16], sizes = [16, 16], strides = [1, 1]} : vector<16x64xf32> to vector<16x16xf32>
    %cst_14 = arith.constant dense<0.000000e+00> : vector<16x16xf32>
    %44 = tpu.matmul %41, %42, %cst_14 {dimension_numbers = #tpu.dot_dimension_numbers<[1], [1], [0], [0], [0, 0, 1, 0], [], []>} : vector<16x16xf32>, vector<16x16xf32>, vector<16x16xf32> -> vector<16x16xf32>
    %45 = arith.addf %44, %10 : vector<16x16xf32>
    %cst_15 = arith.constant dense<0xFF800000> : vector<16xf32>
    %46 = vector.multi_reduction <maximumf>, %45, %cst_15 [1] : vector<16x16xf32> to vector<16xf32>
    %47 = vector.shape_cast %46 : vector<16xf32> to vector<16x1xf32>
    %48 = vector.broadcast %47 : vector<16x1xf32> to vector<16x16xf32>
    %49 = arith.subf %45, %48 : vector<16x16xf32>
    %50 = math.exp %49 : vector<16x16xf32>
    %cst_16 = arith.constant dense<0.000000e+00> : vector<16xf32>
    %51 = vector.multi_reduction <add>, %50, %cst_16 [1] : vector<16x16xf32> to vector<16xf32>
    %52 = vector.shape_cast %51 : vector<16xf32> to vector<16x1xf32>
    %53 = tpu.reciprocal %52 {approx = true} : vector<16x1xf32> -> vector<16x1xf32>
    %54 = vector.broadcast %53 : vector<16x1xf32> to vector<16x16xf32>
    %55 = arith.mulf %50, %54 : vector<16x16xf32>
    %cst_17 = arith.constant dense<0.000000e+00> : vector<16x16xf32>
    %56 = tpu.matmul %55, %43, %cst_17 {dimension_numbers = #tpu.dot_dimension_numbers<[1], [0], [0], [1], [0, 0, 1, 1], [], []>} : vector<16x16xf32>, vector<16x16xf32>, vector<16x16xf32> -> vector<16x16xf32>
    %57 = arith.truncf %56 : vector<16x16xf32> to vector<16x16xbf16>
    %58 = vector.extract_strided_slice %19 {offsets = [16, 0], sizes = [16, 64], strides = [1, 1]} : vector<64x64xbf16> to vector<16x64xbf16>
    %cst_18 = arith.constant dense<0.000000e+00> : vector<16x64xf32>
    %59 = tpu.matmul %57, %58, %cst_18 {dimension_numbers = #tpu.dot_dimension_numbers<[1], [0], [0], [1], [0, 0, 1, 1], [], []>} : vector<16x16xbf16>, vector<16x64xbf16>, vector<16x64xf32> -> vector<16x64xf32>
    %60 = arith.addf %40, %59 : vector<16x64xf32>
    %61 = vector.extract_strided_slice %16 {offsets = [0, 32], sizes = [16, 16], strides = [1, 1]} : vector<16x64xf32> to vector<16x16xf32>
    %62 = vector.extract_strided_slice %17 {offsets = [0, 32], sizes = [16, 16], strides = [1, 1]} : vector<16x64xf32> to vector<16x16xf32>
    %63 = vector.extract_strided_slice %18 {offsets = [0, 32], sizes = [16, 16], strides = [1, 1]} : vector<16x64xf32> to vector<16x16xf32>
    %cst_19 = arith.constant dense<0.000000e+00> : vector<16x16xf32>
    %64 = tpu.matmul %61, %62, %cst_19 {dimension_numbers = #tpu.dot_dimension_numbers<[1], [1], [0], [0], [0, 0, 1, 0], [], []>} : vector<16x16xf32>, vector<16x16xf32>, vector<16x16xf32> -> vector<16x16xf32>
    %65 = arith.addf %64, %10 : vector<16x16xf32>
    %cst_20 = arith.constant dense<0xFF800000> : vector<16xf32>
    %66 = vector.multi_reduction <maximumf>, %65, %cst_20 [1] : vector<16x16xf32> to vector<16xf32>
    %67 = vector.shape_cast %66 : vector<16xf32> to vector<16x1xf32>
    %68 = vector.broadcast %67 : vector<16x1xf32> to vector<16x16xf32>
    %69 = arith.subf %65, %68 : vector<16x16xf32>
    %70 = math.exp %69 : vector<16x16xf32>
    %cst_21 = arith.constant dense<0.000000e+00> : vector<16xf32>
    %71 = vector.multi_reduction <add>, %70, %cst_21 [1] : vector<16x16xf32> to vector<16xf32>
    %72 = vector.shape_cast %71 : vector<16xf32> to vector<16x1xf32>
    %73 = tpu.reciprocal %72 {approx = true} : vector<16x1xf32> -> vector<16x1xf32>
    %74 = vector.broadcast %73 : vector<16x1xf32> to vector<16x16xf32>
    %75 = arith.mulf %70, %74 : vector<16x16xf32>
    %cst_22 = arith.constant dense<0.000000e+00> : vector<16x16xf32>
    %76 = tpu.matmul %75, %63, %cst_22 {dimension_numbers = #tpu.dot_dimension_numbers<[1], [0], [0], [1], [0, 0, 1, 1], [], []>} : vector<16x16xf32>, vector<16x16xf32>, vector<16x16xf32> -> vector<16x16xf32>
    %77 = arith.truncf %76 : vector<16x16xf32> to vector<16x16xbf16>
    %78 = vector.extract_strided_slice %19 {offsets = [32, 0], sizes = [16, 64], strides = [1, 1]} : vector<64x64xbf16> to vector<16x64xbf16>
    %cst_23 = arith.constant dense<0.000000e+00> : vector<16x64xf32>
    %79 = tpu.matmul %77, %78, %cst_23 {dimension_numbers = #tpu.dot_dimension_numbers<[1], [0], [0], [1], [0, 0, 1, 1], [], []>} : vector<16x16xbf16>, vector<16x64xbf16>, vector<16x64xf32> -> vector<16x64xf32>
    %80 = arith.addf %60, %79 : vector<16x64xf32>
    %81 = vector.extract_strided_slice %16 {offsets = [0, 48], sizes = [16, 16], strides = [1, 1]} : vector<16x64xf32> to vector<16x16xf32>
    %82 = vector.extract_strided_slice %17 {offsets = [0, 48], sizes = [16, 16], strides = [1, 1]} : vector<16x64xf32> to vector<16x16xf32>
    %83 = vector.extract_strided_slice %18 {offsets = [0, 48], sizes = [16, 16], strides = [1, 1]} : vector<16x64xf32> to vector<16x16xf32>
    %cst_24 = arith.constant dense<0.000000e+00> : vector<16x16xf32>
    %84 = tpu.matmul %81, %82, %cst_24 {dimension_numbers = #tpu.dot_dimension_numbers<[1], [1], [0], [0], [0, 0, 1, 0], [], []>} : vector<16x16xf32>, vector<16x16xf32>, vector<16x16xf32> -> vector<16x16xf32>
    %85 = arith.addf %84, %10 : vector<16x16xf32>
    %cst_25 = arith.constant dense<0xFF800000> : vector<16xf32>
    %86 = vector.multi_reduction <maximumf>, %85, %cst_25 [1] : vector<16x16xf32> to vector<16xf32>
    %87 = vector.shape_cast %86 : vector<16xf32> to vector<16x1xf32>
    %88 = vector.broadcast %87 : vector<16x1xf32> to vector<16x16xf32>
    %89 = arith.subf %85, %88 : vector<16x16xf32>
    %90 = math.exp %89 : vector<16x16xf32>
    %cst_26 = arith.constant dense<0.000000e+00> : vector<16xf32>
    %91 = vector.multi_reduction <add>, %90, %cst_26 [1] : vector<16x16xf32> to vector<16xf32>
    %92 = vector.shape_cast %91 : vector<16xf32> to vector<16x1xf32>
    %93 = tpu.reciprocal %92 {approx = true} : vector<16x1xf32> -> vector<16x1xf32>
    %94 = vector.broadcast %93 : vector<16x1xf32> to vector<16x16xf32>
    %95 = arith.mulf %90, %94 : vector<16x16xf32>
    %cst_27 = arith.constant dense<0.000000e+00> : vector<16x16xf32>
    %96 = tpu.matmul %95, %83, %cst_27 {dimension_numbers = #tpu.dot_dimension_numbers<[1], [0], [0], [1], [0, 0, 1, 1], [], []>} : vector<16x16xf32>, vector<16x16xf32>, vector<16x16xf32> -> vector<16x16xf32>
    %97 = arith.truncf %96 : vector<16x16xf32> to vector<16x16xbf16>
    %98 = vector.extract_strided_slice %19 {offsets = [48, 0], sizes = [16, 64], strides = [1, 1]} : vector<64x64xbf16> to vector<16x64xbf16>
    %cst_28 = arith.constant dense<0.000000e+00> : vector<16x64xf32>
    %99 = tpu.matmul %97, %98, %cst_28 {dimension_numbers = #tpu.dot_dimension_numbers<[1], [0], [0], [1], [0, 0, 1, 1], [], []>} : vector<16x16xbf16>, vector<16x64xbf16>, vector<16x64xf32> -> vector<16x64xf32>
    %100 = arith.addf %80, %99 : vector<16x64xf32>
    %c1 = arith.constant 1 : index
    %c0_29 = arith.constant 0 : index
    %101 = vector.load %arg4[%c1, %c0_29] : memref<16x256xf32, #tpu.memory_space<vmem>>, vector<1x64xf32>
    %102 = vector.broadcast %101 : vector<1x64xf32> to vector<16x64xf32>
    %103 = arith.addf %100, %102 : vector<16x64xf32>
    %104 = arith.addf %4, %103 : vector<16x64xf32>
    %cst_30 = arith.constant dense<0.000000e+00> : vector<16xf32>
    %105 = vector.multi_reduction <add>, %104, %cst_30 [1] : vector<16x64xf32> to vector<16xf32>
    %106 = vector.shape_cast %105 : vector<16xf32> to vector<16x1xf32>
    %cst_31 = arith.constant 6.400000e+01 : f32
    %107 = vector.broadcast %cst_31 : f32 to vector<16x1xf32>
    %108 = arith.divf %106, %107 : vector<16x1xf32>
    %109 = vector.broadcast %108 : vector<16x1xf32> to vector<16x64xf32>
    %110 = arith.subf %104, %109 : vector<16x64xf32>
    %111 = arith.mulf %110, %110 : vector<16x64xf32>
    %cst_32 = arith.constant dense<0.000000e+00> : vector<16xf32>
    %112 = vector.multi_reduction <add>, %111, %cst_32 [1] : vector<16x64xf32> to vector<16xf32>
    %113 = vector.shape_cast %112 : vector<16xf32> to vector<16x1xf32>
    %cst_33 = arith.constant 6.400000e+01 : f32
    %114 = vector.broadcast %cst_33 : f32 to vector<16x1xf32>
    %115 = arith.divf %113, %114 : vector<16x1xf32>
    %c2 = arith.constant 2 : index
    %c0_34 = arith.constant 0 : index
    %116 = vector.load %arg4[%c2, %c0_34] : memref<16x256xf32, #tpu.memory_space<vmem>>, vector<1x64xf32>
    %c3 = arith.constant 3 : index
    %c0_35 = arith.constant 0 : index
    %117 = vector.load %arg4[%c3, %c0_35] : memref<16x256xf32, #tpu.memory_space<vmem>>, vector<1x64xf32>
    %118 = vector.broadcast %108 : vector<16x1xf32> to vector<16x64xf32>
    %119 = arith.subf %104, %118 : vector<16x64xf32>
    %cst_36 = arith.constant 9.99999974E-6 : f32
    %120 = vector.broadcast %cst_36 : f32 to vector<16x1xf32>
    %121 = arith.addf %115, %120 : vector<16x1xf32>
    %122 = math.rsqrt %121 : vector<16x1xf32>
    %123 = vector.broadcast %122 : vector<16x1xf32> to vector<16x64xf32>
    %124 = arith.mulf %119, %123 : vector<16x64xf32>
    %125 = vector.broadcast %116 : vector<1x64xf32> to vector<16x64xf32>
    %126 = arith.mulf %124, %125 : vector<16x64xf32>
    %127 = vector.broadcast %117 : vector<1x64xf32> to vector<16x64xf32>
    %128 = arith.addf %126, %127 : vector<16x64xf32>
    %c64 = arith.constant 64 : index
    %c0_37 = arith.constant 0 : index
    %129 = vector.load %arg3[%c64, %c0_37] : memref<256x256xbf16, #tpu.memory_space<vmem>>, vector<64x256xbf16>
    %c4 = arith.constant 4 : index
    %c0_38 = arith.constant 0 : index
    %130 = vector.load %arg4[%c4, %c0_38] : memref<16x256xf32, #tpu.memory_space<vmem>>, vector<1x256xf32>
    %131 = arith.truncf %128 : vector<16x64xf32> to vector<16x64xbf16>
    %cst_39 = arith.constant dense<0.000000e+00> : vector<16x256xf32>
    %132 = tpu.matmul %131, %129, %cst_39 {dimension_numbers = #tpu.dot_dimension_numbers<[1], [0], [0], [1], [0, 0, 1, 1], [], []>} : vector<16x64xbf16>, vector<64x256xbf16>, vector<16x256xf32> -> vector<16x256xf32>
    %133 = vector.broadcast %130 : vector<1x256xf32> to vector<16x256xf32>
    %134 = arith.addf %132, %133 : vector<16x256xf32>
    %cst_40 = arith.constant 0.000000e+00 : f32
    %135 = vector.broadcast %cst_40 : f32 to vector<16x256xf32>
    %136 = arith.maximumf %134, %135 : vector<16x256xf32>
    %c128_41 = arith.constant 128 : index
    %c0_42 = arith.constant 0 : index
    %137 = vector.load %arg3[%c128_41, %c0_42] : memref<256x256xbf16, #tpu.memory_space<vmem>>, vector<64x256xbf16>
    %c5 = arith.constant 5 : index
    %c0_43 = arith.constant 0 : index
    %138 = vector.load %arg4[%c5, %c0_43] : memref<16x256xf32, #tpu.memory_space<vmem>>, vector<1x64xf32>
    %139 = arith.truncf %136 : vector<16x256xf32> to vector<16x256xbf16>
    %cst_44 = arith.constant dense<0.000000e+00> : vector<16x64xf32>
    %140 = tpu.matmul %139, %137, %cst_44 {dimension_numbers = #tpu.dot_dimension_numbers<[1], [1], [0], [0], [0, 0, 1, 0], [], []>} : vector<16x256xbf16>, vector<64x256xbf16>, vector<16x64xf32> -> vector<16x64xf32>
    %141 = vector.broadcast %138 : vector<1x64xf32> to vector<16x64xf32>
    %142 = arith.addf %140, %141 : vector<16x64xf32>
    %143 = arith.addf %128, %142 : vector<16x64xf32>
    %cst_45 = arith.constant dense<0.000000e+00> : vector<16xf32>
    %144 = vector.multi_reduction <add>, %143, %cst_45 [1] : vector<16x64xf32> to vector<16xf32>
    %145 = vector.shape_cast %144 : vector<16xf32> to vector<16x1xf32>
    %cst_46 = arith.constant 6.400000e+01 : f32
    %146 = vector.broadcast %cst_46 : f32 to vector<16x1xf32>
    %147 = arith.divf %145, %146 : vector<16x1xf32>
    %148 = vector.broadcast %147 : vector<16x1xf32> to vector<16x64xf32>
    %149 = arith.subf %143, %148 : vector<16x64xf32>
    %150 = arith.mulf %149, %149 : vector<16x64xf32>
    %cst_47 = arith.constant dense<0.000000e+00> : vector<16xf32>
    %151 = vector.multi_reduction <add>, %150, %cst_47 [1] : vector<16x64xf32> to vector<16xf32>
    %152 = vector.shape_cast %151 : vector<16xf32> to vector<16x1xf32>
    %cst_48 = arith.constant 6.400000e+01 : f32
    %153 = vector.broadcast %cst_48 : f32 to vector<16x1xf32>
    %154 = arith.divf %152, %153 : vector<16x1xf32>
    %c6 = arith.constant 6 : index
    %c0_49 = arith.constant 0 : index
    %155 = vector.load %arg4[%c6, %c0_49] : memref<16x256xf32, #tpu.memory_space<vmem>>, vector<1x64xf32>
    %c7 = arith.constant 7 : index
    %c0_50 = arith.constant 0 : index
    %156 = vector.load %arg4[%c7, %c0_50] : memref<16x256xf32, #tpu.memory_space<vmem>>, vector<1x64xf32>
    %157 = vector.broadcast %147 : vector<16x1xf32> to vector<16x64xf32>
    %158 = arith.subf %143, %157 : vector<16x64xf32>
    %cst_51 = arith.constant 9.99999974E-6 : f32
    %159 = vector.broadcast %cst_51 : f32 to vector<16x1xf32>
    %160 = arith.addf %154, %159 : vector<16x1xf32>
    %161 = math.rsqrt %160 : vector<16x1xf32>
    %162 = vector.broadcast %161 : vector<16x1xf32> to vector<16x64xf32>
    %163 = arith.mulf %158, %162 : vector<16x64xf32>
    %164 = vector.broadcast %155 : vector<1x64xf32> to vector<16x64xf32>
    %165 = arith.mulf %163, %164 : vector<16x64xf32>
    %166 = vector.broadcast %156 : vector<1x64xf32> to vector<16x64xf32>
    %167 = arith.addf %165, %166 : vector<16x64xf32>
    %cst_52 = arith.constant dense<0xFF800000> : vector<64xf32>
    %168 = vector.multi_reduction <maximumf>, %167, %cst_52 [0] : vector<16x64xf32> to vector<64xf32>
    %169 = vector.shape_cast %168 : vector<64xf32> to vector<1x64xf32>
    %c192_53 = arith.constant 192 : index
    %c0_54 = arith.constant 0 : index
    %170 = vector.load %arg3[%c192_53, %c0_54] : memref<256x256xbf16, #tpu.memory_space<vmem>>, vector<64x128xbf16>
    %c8 = arith.constant 8 : index
    %c0_55 = arith.constant 0 : index
    %171 = vector.load %arg4[%c8, %c0_55] : memref<16x256xf32, #tpu.memory_space<vmem>>, vector<1x128xf32>
    %172 = arith.truncf %169 : vector<1x64xf32> to vector<1x64xbf16>
    %cst_56 = arith.constant dense<0.000000e+00> : vector<1x128xf32>
    %173 = tpu.matmul %172, %170, %cst_56 {dimension_numbers = #tpu.dot_dimension_numbers<[1], [0], [0], [1], [0, 0, 1, 1], [], []>} : vector<1x64xbf16>, vector<64x128xbf16>, vector<1x128xf32> -> vector<1x128xf32>
    %174 = arith.addf %173, %171 : vector<1x128xf32>
    %175 = arith.negf %174 : vector<1x128xf32>
    %176 = math.exp %175 : vector<1x128xf32>
    %cst_57 = arith.constant 1.000000e+00 : f32
    %177 = vector.broadcast %cst_57 : f32 to vector<1x128xf32>
    %178 = arith.addf %177, %176 : vector<1x128xf32>
    %179 = arith.divf %177, %178 : vector<1x128xf32>
    %c0_58 = arith.constant 0 : index
    %c0_59 = arith.constant 0 : index
    %c0_60 = arith.constant 0 : index
    %180 = vector.load %arg5[%c0_58, %c0_59, %c0_60] : memref<1x1x128xf32, #tpu.memory_space<vmem>>, vector<1x1x128xf32>
    %181 = vector.shape_cast %180 : vector<1x1x128xf32> to vector<1x128xf32>
    %182 = vector.shape_cast %179 : vector<1x128xf32> to vector<1x1x128xf32>
    tpu.vector_store %arg5[%c0_58, %c0_59, %c0_60], %182 {strides = array<i32>} : memref<1x1x128xf32, #tpu.memory_space<vmem>>, vector<1x1x128xf32>,
    return
  }
  func.func @transform_0(%arg0: i32, %arg1: memref<4xi32, #tpu.memory_space<smem>>) -> (i32, i32, i32) {
    %c0_i32 = arith.constant 0 : i32
    %c0_i32_0 = arith.constant 0 : i32
    %c0_i32_1 = arith.constant 0 : i32
    return %arg0, %c0_i32, %c0_i32_0 : i32, i32, i32
  }
  func.func @transform_1(%arg0: i32, %arg1: memref<4xi32, #tpu.memory_space<smem>>) -> (i32, i32) {
    %c0_i32 = arith.constant 0 : i32
    %c0_i32_0 = arith.constant 0 : i32
    %c0_i32_1 = arith.constant 0 : i32
    return %c0_i32, %c0_i32_0 : i32, i32
  }
  func.func @transform_2(%arg0: i32, %arg1: memref<4xi32, #tpu.memory_space<smem>>) -> (i32, i32) {
    %c0_i32 = arith.constant 0 : i32
    %c0_i32_0 = arith.constant 0 : i32
    %c0_i32_1 = arith.constant 0 : i32
    return %c0_i32, %c0_i32_0 : i32, i32
  }
  func.func @transform_3(%arg0: i32, %arg1: memref<4xi32, #tpu.memory_space<smem>>) -> (i32, i32, i32) {
    %c0_i32 = arith.constant 0 : i32
    %c0_i32_0 = arith.constant 0 : i32
    %c0_i32_1 = arith.constant 0 : i32
    return %arg0, %c0_i32, %c0_i32_0 : i32, i32, i32
  }
}

</mosaic_0001>

<bundles_post_ra>
// kernel: tpu_custom_call.1
= control target key start
LH: loop header
LB: loop body
LE: loop exit
PB: predicated region body
PF: predicated region fallthrough
CT: control target
= control target key end

     0   :  { %s2906_s0 = inlined_call_operand.hbm [shape: s32[4], index: 0, kind: input, shape index: {}]   ;;  %s2907_s1 = inlined_call_operand.hbm [shape: bf16[4,16,64], index: 1, kind: input, shape index: {}]   ;;  %s2908_s2 = inlined_call_operand.hbm [shape: bf16[256,256], index: 2, kind: input, shape index: {}]   ;;  %s2909_s3 = inlined_call_operand.hbm [shape: f32[16,256], index: 3, kind: input, shape index: {}]   ;;  %s2910_s4 = inlined_call_operand.hbm [shape: f32[4,1,128], index: 4, kind: output, shape index: {}]  }
   0x1   :  { %s2291_s17 = scalar_lea.hbm %s2906_s0, 16 }
   0x2   :  { %p2292_p0 = scmp.ne.s32.totalorder %s2906_s0, %s2291_s17  ;;  %p2295_p1 = scmp.lt.u32.totalorder %s2291_s17, %s2906_s0 }
   0x4   :  { %p2297_p2 = pnand %p2295_p1, %p2292_p0 }
   0x6   :  { %2300 = shalt.err (!%p2297_p2)  }
   0x7   :  { %s2461_s22 = smov [#allocation3]  }
   0x8   :  { %10 = dma.hbm_to_smem %s2906_s0, 16, %s2461_s22, [#allocation2] }
   0x9   :  { %2431 = dma.done.wait [#allocation2], 16 }
   0xa   :  { %2432 = vsyncadd [#allocation2], 4294967280 }
   0xb   :  { %12 = sfence }
   0xc   :  { %13 = vsyncpa [#allocation5], 0 }
   0xd   :  { %15 = vsyncpa [#allocation5 + $0x1], 0 }
   0xe   :  { %16 = vsyncpa [#allocation8], 0 }
   0xf   :  { %17 = vsyncpa [#allocation6], 0 }
  0x10   :  { %19 = vsyncpa [#allocation6 + $0x1], 0  ;;  %s2520_s25 = smov 0   ;;  %s2522_s26 = smov 0  }
  0x11   :  { %s2524_s27 = smov 0   ;;  %s2526_s28 = smov 0  }
  0x12 LB: > { %s2541_s0 = sadd.s32 4294967295, %s2459_s28   ;;  %s1823_s29 = sadd.s32 4294967294, %s2459_s28   ;;  %s2459_s28 = sphi %s2526_s28, %s2931_s28   ;;  %s2455_s27 = sphi %s2524_s27, %s2930_s27   ;;  %s2451_s26 = sphi %s2522_s26, %s2929_s26   ;;  %s2447_s25 = sphi %s2520_s25, %s2928_s25  }
  0x13   : > { %p45_p3 = scmp.ne.s32.totalorder %s2451_s26, %s2447_s25  ;;  %p2911_p4 = scmp.eq.s32.totalorder %s2541_s0, 0 }
  0x14   : > { %p117_p6 = scmp.eq.s32.totalorder %s1823_s29, 3  ;;  %p1824_p8 = scmp.ge.s32.totalorder %s2459_s28, 1 }
  0x15   : > { %p2550_p7 = por %p2911_p4, %p45_p3  ;;  %p124_p10 = scmp.lt.s32.totalorder %s2459_s28, 5 }
  0x16   : > { %p2555_p9 = por %p117_p6, %p45_p3  ;;  %s2462_s7 = smov [#allocation7]  }
  0x17   : > { %s2914_s30 = scalar_select %p2550_p7, 1, 0 }
  0x18   : > { %s2915_s5 = scalar_select %p2555_p9, 1, 0 }
  0x19   : > { %p2560_p11 = pnand %p1824_p8, %p124_p10  ;;  %s136_s8 = sshll.u32 %s2462_s7, 4  ;;  %s137_s8 = int_to_ptr.vmem [resolvable:$true] %s136_s8 }
  0x1a   : > { %s2463_s10 = smov [#allocation9]   ;;  %s2301_s14 = scalar_lea.hbm %s2908_s2, 4096 }
  0x1b   : > { %s2916_s6 = scalar_select %p2560_p11, 1, 0 }
  0x1c   : > { %p2093_p12 = pneg %p2560_p11  ;;  %s149_s11 = sshll.u32 %s2463_s10, 4  ;;  %s2572_s11 = int_to_ptr.vmem [resolvable:$true] %s149_s11 }
  0x1d   : > { %p2302_p0 = scmp.ne.s32.totalorder %s2908_s2, %s2301_s14  ;;  %p2308_p6 = scmp.lt.u32.totalorder %s2301_s14, %s2908_s2 }
  0x1e   : > { %p2568_p13 = pnand %p2093_p12, %p2911_p4 }
  0x20   : > { %p2303_p1 = pneg %p2568_p13 }
  0x22   : > { %p2304_p2 = pnand %p2303_p1, %p2302_p0 }
  0x24   : > { %p2305_p3 = pneg %p2304_p2 }
  0x26   : > { %p2310_p8 = pnand %p2308_p6, %p2305_p3 }
  0x28   : > { %2313 = shalt.err (!%p2310_p8)
}
  0x29   : > { %s2314_s19 = scalar_lea.vmem %s137_s8, 4096  ;;  %p2322_p5 = scmp.lt.s32.totalorder %s137_s8, %s137_s8 }
  0x2a   : > { %p2315_p10 = scmp.ne.s32.totalorder %s137_s8, %s2314_s19  ;;  %p2323_p9 = scmp.lt.s32.totalorder %s2314_s19, %s2314_s19 }
  0x2c   : > { %p2317_p12 = pnand %p2315_p10, %p2303_p1  ;;  %p2324_p7 = por %p2323_p9, %p2322_p5 }
  0x2e   : > { %p2318_p4 = pneg %p2317_p12 }
  0x30   : > { %p2325_p11 = pnand %p2324_p7, %p2318_p4 }
  0x32   : > { %2328 = shalt.err (!%p2325_p11)
}
  0x33   : > { %s2464_s20 = smov 128   ;;  %s2465_s21 = smov 8  }
  0x34   : > { %2096 = dma.hbm_to_vmem [thread:$0]  (!%p2568_p13), %s2908_s2, 4096, %s137_s8, [#allocation8], %s2464_s20, %s2464_s20, %s2465_s21  }
  0x35   : > { %s2329_s7 = scalar_lea.hbm %s2909_s3, 512 }
  0x36   : > { %p2330_p0 = scmp.ne.s32.totalorder %s2909_s3, %s2329_s7  ;;  %p2336_p7 = scmp.lt.u32.totalorder %s2329_s7, %s2909_s3 }
  0x38   : > { %p2332_p4 = pnand %p2330_p0, %p2303_p1 }
  0x3a   : > { %p2333_p5 = pneg %p2332_p4 }
  0x3c   : > { %p2338_p9 = pnand %p2336_p7, %p2333_p5 }
  0x3e   : > { %2341 = shalt.err (!%p2338_p9)
}
  0x3f   : > { %s2342_s8 = scalar_lea.vmem %s2572_s11, 512  ;;  %p2350_p6 = scmp.lt.s32.totalorder %s2572_s11, %s2572_s11 }
  0x40   : > { %p2343_p11 = scmp.ne.s32.totalorder %s2572_s11, %s2342_s8  ;;  %p2351_p8 = scmp.lt.s32.totalorder %s2342_s8, %s2342_s8 }
  0x42   : > { %p2345_p2 = pnand %p2343_p11, %p2303_p1  ;;  %p2352_p10 = por %p2351_p8, %p2350_p6 }
  0x44   : > { %p2346_p3 = pneg %p2345_p2 }
  0x46   : > { %p2353_p12 = pnand %p2352_p10, %p2346_p3 }
  0x48   : > { %2356 = shalt.err (!%p2353_p12)
}
  0x49   : > { %s2466_s15 = smov 256   ;;  %s2467_s16 = smov 16  }
  0x4a   : > { %2099 = dma.hbm_to_vmem [thread:$0]  (!%p2568_p13), %s2909_s3, 512, %s2572_s11, [#allocation8], %s2466_s15, %s2466_s15, %s2467_s16  }
  0x4b   : > { %s2622_s19 = sadd.s32 1, %s2459_s28   ;;  %s32_s21 = sadd.s32 1, %s2455_s27 }
  0x4c   : > { %s29_s20 = ssub.s32 %s2459_s28, %s2622_s19  ;;  %p39_p0 = scmp.ne.s32.totalorder %s2455_s27, %s2451_s26 }
  0x4d   : > { %p30_p1 = scmp.eq.s32.totalorder %s29_s20, 0  ;;  %p40_p4 = scmp.eq.s32.totalorder %s2459_s28, 0 }
  0x4e   : > { %p2918_p7 = scmp.eq.s32.totalorder %s2541_s0, 3  ;;  %p2110_p11 = scmp.lt.s32.totalorder %s2459_s28, 4 }
  0x4f   : > { %s2631_s22 = scalar_select %p30_p1, %s2455_s27, %s32_s21  }
  0x50   : > { %p41_p5 = por %p40_p4, %p39_p0  ;;  %p2635_p9 = por %p2918_p7, %p39_p0 }
  0x51   : > { %s163_s9 = sand.u32 1, %s2455_s27   ;;  %s1903_s11 = sshll.u32 %s2459_s28, 7 }
  0x52   : > { %s1828_s24 = sshll.u32 %s163_s9, 3  ;;  %s2645_s10 = scalar_lea.hbm %s2907_s1, %s1903_s11 }
  0x53   : > { %s167_s12 = scalar_lea.vmem [#allocation4], %s1828_s24  ;;  %p2649_p13 = pnand %p2110_p11, %p41_p5 }
  0x54   : > { %s174_s13 = sshll.u32 %s167_s12, 4  ;;  %s2653_s8 = scalar_lea.sflag [#allocation5], %s163_s9  ;;  %s2647_s13 = int_to_ptr.vmem [resolvable:$true] %s174_s13 }
  0x55   : > { %s2357_s15 = scalar_lea.hbm %s2645_s10, 128  ;;  %p2359_p3 = pneg %p2649_p13 }
  0x56   : > { %p2358_p2 = scmp.ne.s32.totalorder %s2645_s10, %s2357_s15  ;;  %s2362_s18 = scalar_lea.hbm %s2907_s1, 512 }
  0x57   : > { %p2363_p10 = scmp.lt.u32.totalorder %s2645_s10, %s2907_s1  ;;  %p2364_p12 = scmp.lt.u32.totalorder %s2362_s18, %s2357_s15 }
  0x58   : > { %p2360_p6 = pnand %p2359_p3, %p2358_p2  ;;  %p2366_p0 = scmp.lt.u32.totalorder %s2357_s15, %s2645_s10 }
  0x59   : > { %p2365_p1 = por %p2364_p12, %p2363_p10 }
  0x5a   : > { %p2361_p8 = pneg %p2360_p6 }
  0x5b   : > { %p2367_p4 = por %p2366_p0, %p2365_p1 }
  0x5d   : > { %p2368_p5 = pnand %p2367_p4, %p2361_p8 }
  0x5f   : > { %2371 = shalt.err (!%p2368_p5)
}
  0x60   : > { %s2372_s9 = scalar_lea.vmem %s2647_s13, 128  ;;  %s2468_s24 = smov [#allocation4]  }
  0x61   : > { %p2373_p7 = scmp.ne.s32.totalorder %s2647_s13, %s2372_s9  ;;  %s2377_s11 = sshll.u32 %s2468_s24, 4  ;;  %s2378_s11 = int_to_ptr.vmem [resolvable:$false] %s2377_s11 }
  0x62   : > { %s2379_s29 = scalar_lea.vmem %s2378_s11, 256  ;;  %p2380_p6 = scmp.lt.s32.totalorder %s2647_s13, %s2378_s11 }
  0x63   : > { %p2375_p11 = pnand %p2373_p7, %p2359_p3  ;;  %p2381_p10 = scmp.lt.s32.totalorder %s2379_s29, %s2372_s9 }
  0x65   : > { %p2376_p2 = pneg %p2375_p11  ;;  %p2382_p12 = por %p2381_p10, %p2380_p6 }
  0x67   : > { %p2383_p1 = pnand %p2382_p12, %p2376_p2 }
  0x69   : > { %2386 = shalt.err (!%p2383_p1)
}
  0x6a   : > { %s2469_s7 = smov 64   ;;  %s2470_s12 = smov 4  }
  0x6b   : > { %2103 = dma.hbm_to_vmem [thread:$0]  (!%p2649_p13), %s2645_s10, 128, %s2647_s13, %s2653_s8, %s2469_s7, %s2469_s7, %s2470_s12  }
  0x6c   : > { %p2921_p3 = scmp.ne.s32.totalorder %s2916_s6, 0 }
  0x6d   : > { %s2684_s15 = sand.u32 (!%p2921_p3), 1, %s2451_s26   ;;  %p2922_p8 = scmp.ne.s32.totalorder (!%p2921_p3), %s2914_s30, 0 }
  0x6e   : > { %186 = sbr.rel (%p2921_p3) target bundleno = 4629 (0x1215), region = 32  ;;  %s1832_s16 = sshll.u32 (!%p2921_p3), %s2684_s15, 3 }
  0x6f   : > { %s189_s17 = scalar_lea.sflag (!%p2921_p3), [#allocation5], %s2684_s15  ;;  %s192_s18 = scalar_lea.vmem (!%p2921_p3), [#allocation4], %s1832_s16 }
  0x75   : > { %2434 = dma.done.wait (%p2922_p8), %s189_s17, 128  }
  0x76   : > { %2436 = vsyncadd (%p2922_p8), %s189_s17, 4294967168  ;;  %p2923_p0 = scmp.eq.s32.totalorder %s2541_s0, 0 }
  0x78   : > { %2438 = dma.done.wait (%p2923_p0), [#allocation8], 4608   ;;  %p2924_p13 = pmov %p2923_p0 }
  0x79   : > { %v2471_v0 = vmov 0   ;;  %v2201_v1 = vld [vmem:[#allocation7 + $0x4] ss:$8 sps:$4 sm:$0xff]   ;;  %v2203_v2 = vld [vmem:[#allocation7] ss:$8 sps:$4 sm:$0xff]   ;;  %v2697_v9 = vld [vmem:[%s192_s18] sm:$0xff]   ;;  %v228_v10 = vlaneseq }
  0x7a   : > { %2440 = vsyncadd (%p2924_p13), [#allocation8], 4294962688  ;;  %334 = vmatprep.mubr.bf16.mxu0 %v2471_v0  ;;  %302 = vmatprep.subr.bf16.mxu0 %v2201_v1  ;;  %v2204_v3 = vld [vmem:[#allocation7 + $0x14] ss:$8 sps:$4 sm:$0xff]   ;;  %v2206_v4 = vld [vmem:[#allocation7 + $0x10] ss:$8 sps:$4 sm:$0xff]  }
  0x7b   : > { %303 = vmatpush1.bf16.msra.mxu0 %v2203_v2  ;;  %v2207_v5 = vld [vmem:[#allocation7 + $0x24] ss:$8 sps:$4 sm:$0xff]   ;;  %v2209_v6 = vld [vmem:[#allocation7 + $0x20] ss:$8 sps:$4 sm:$0xff]   ;;  %v2210_v7 = vld [vmem:[#allocation7 + $0x34] ss:$8 sps:$4 sm:$0xff]  }
  0x7c   : > { %304 = vmatprep.subr.bf16.mxu0 %v2204_v3  ;;  %v2212_v8 = vld [vmem:[#allocation7 + $0x30] ss:$8 sps:$4 sm:$0xff]   ;;  %vm298_vm0 = vcmask 523264   ;;  %v2701_v11 = vshrl.u32 %v228_v10, 7  ;;  %vm359_vm1 = vcmask 130048   ;;  %s2472_s30 = smov 64  }
  0x7d   : > { %v241_v13 = vld [vmem:[#allocation9] ss:$8 sm:$0x3]  ;;  %vm2724_vm2 = vmpackc.low %vm359_vm1, %vm359_vm1  ;;  %s223_s6 = sld [smem:[#allocation3 + %s2541_s0]]  ;;  %v229_v33 = vand.u32 127, %v228_v10  ;;  %s2474_s10 = smov 48  }
  0x7e   : > { %v245_v12 = vsub.s32 0, %v2701_v11  ;;  %v249_v14 = vsub.s32 1, %v2701_v11  ;;  %v2473_v35 = vmov -1e+09   ;;  %s2475_s13 = smov 112   ;;  %s2476_s14 = smov 96  }
  0x7f   : > { %305 = vmatpush1.bf16.msra.mxu0 %v2206_v4  ;;  %s2478_s8 = smov 32   ;;  %vm2479_vm4 = vmmov 0   ;;  %s2480_s20 = smov 16  }
  0x80   : > { %306 = vmatprep.subr.bf16.mxu0 %v2207_v5  ;;  %v246_v15 = vrot.slane %v241_v13, %v245_v12  ;;  %v250_v17 = vrot.slane %v241_v13, %v249_v14  ;;  %s2481_s21 = smov 80   ;;  %s1900_s9 = sshll.u32 %s2541_s0, 4 }
  0x81   : > { %s221_s24 = scalar_lea.vmem [#allocation10], %s2684_s15  ;;  %s2863_s12 = scalar_lea.hbm %s2910_s4, %s1900_s9 }
  0x82   : > { %s1738_s11 = sshll.u32 %s221_s24, 4  ;;  %s1726_s16 = scalar_lea.sflag [#allocation6], %s2684_s15  ;;  %s2865_s11 = int_to_ptr.vmem [resolvable:$true] %s1738_s11 }
  0x83   : > { %307 = vmatpush1.bf16.msra.mxu0 %v2209_v6  ;;  %v230_v34 = vstv %s223_s6  ;;  %s2387_s17 = scalar_lea.vmem %s2865_s11, 16  ;;  %s2482_s0 = smov [#allocation10]  }
  0x84   : > { %308 = vmatprep.subr.bf16.mxu0 %v2210_v7  ;;  %vm231_vm3 = vcmp.lt.s32.totalorder %v229_v33, %v230_v34  ;;  %p2388_p4 = scmp.ne.s32.totalorder %s2865_s11, %s2387_s17  ;;  %s2391_s18 = sshll.u32 %s2482_s0, 4  ;;  %s2392_s18 = int_to_ptr.vmem [resolvable:$false] %s2391_s18 }
  0x85   : > { %v2735_v36 = vsel %vm231_vm3, 0.0, %v2473_v35  ;;  %p2394_p11 = scmp.lt.s32.totalorder %s2865_s11, %s2392_s18 }
  0x86   : > { %p2389_p5 = pnand %p2388_p4, %p2635_p9 }
  0x87   : > { %309 = vmatpush1.bf16.msra.mxu0 %v2212_v8 }
  0x88   : > { %p2390_p7 = pneg %p2389_p5 }
  0x8a   : > { %1844 = vmatmul.mubr.msk.bf16.vlgmr.msra.gmra.mrb[0].mxu0 %vm298_vm0, %v2697_v9 }
 0x15d   : > { %v336_v16 = vpop.f32.mrb[0].mxu0 }
 0x15e   : > { %v2709_v18 = vadd.f32 %v336_v16, %v246_v15  ;;  %v338_v19 = vpop.f32.mrb[1].mxu0 }
 0x15f   : > { %v340_v20 = vpop.f32.mrb[2].mxu0  ;;  %v339_v23 = vadd.f32 %v338_v19, %v250_v17 }
 0x160   : > { %v2711_v21 = vadd.f32 %v340_v20, %v246_v15  ;;  %v342_v22 = vpop.f32.mrb[3].mxu0  ;;  %1953 = vmatprep.mubr.msk.f32.mxu1 %vm359_vm1, %v2709_v18 }
 0x161   : > { %v343_v24 = vadd.f32 %v342_v22, %v250_v17 }
 0x162   : > { %v2717_v25 = vpack.i.bf16 %v2711_v21, %v2709_v18 }
 0x163   : > { %v2047_v26 = vpack.c.bf16 %v343_v24, %v339_v23  ;;  %v2719_v27 = vpack.i.bf16 %v343_v24, %v339_v23 }
 0x164   : > { %2167 = vrot.lane.b32.xlu0 %v2717_v25, %s2472_s30  ;;  %s2393_s30 = scalar_lea.vmem %s2392_s18, 32 }
 0x165   : > { %p2395_p2 = scmp.lt.s32.totalorder %s2393_s30, %s2387_s17 }
 0x167   : > { %p2396_p6 = por %p2395_p2, %p2394_p11 }
 0x169   : > { %p2397_p10 = pnand %p2396_p6, %p2390_p7 }
 0x1d6   : > { %v2168_v28 = vpop.permute.xlu0 %2167 }
 0x1d7   : > { %v2170_v29 = vunpack.i.h.bf16 %v2168_v28  ;;  %v2169_v30 = vunpack.i.l.bf16 %v2168_v28 }
 0x1d9   : > { %v2041_v32 = vpack.c.bf16 %v2170_v29, %v2169_v30  ;;  %v2214_v29 = vld [vmem:[#allocation7 + $0xd4] ss:$8 sps:$4 sm:$0xff]   ;;  %v2477_v30 = vmov 0.0  }
 0x1db   : > { %2043 = vmatprep.subr.msk.bf16.mxu1 %vm2724_vm2, %v2041_v32 }
 0x1dc   : > { %2046 = vmatpush3.bf16.xpose.msk.msra.mxu1 %vm2724_vm2, %v2041_v32 }
 0x1dd   : > { %2048 = vmatprep.subr.bf16.mxu1 %v2047_v26 }
 0x1e3   : > { %1954 = vmatmul.mubr.msk.f32.vlgmr.msra.gmra.mrb[0].mxu1 %vm359_vm1, %v2711_v21 }
 0x1e4   : > { %2050 = vmatpush3.bf16.msra.mxu1 %v2047_v26 }
 0x2b6   : > { %v1955_v37 = vpop.f32.mrb[0].mxu1 }
 0x2b7   : > { %v440_v38 = vadd.f32 %v1955_v37, %v2735_v36  ;;  %v434_v39 = vpop.f32.mrb[1].mxu1 }
 0x2b8   : > { %v435_v40 = vadd.f32 %v434_v39, %v2735_v36 }
 0x2b9   : > { %v446_v41 = vsel %vm359_vm1, %v440_v38, -inf }
 0x2ba   : > { %447 = vmax.xlane.f32.xlu1 %v446_v41  ;;  %v443_v42 = vsel %vm359_vm1, %v435_v40, -inf }
 0x2bb   : > { %444 = vmax.xlane.f32.xlu0 %v443_v42 }
 0x2cb   : > { %2172 = vrot.lane.b32.xlu1 %v2717_v25, %s2474_s10 }
 0x2cf   : > { %547 = vrot.lane.b32.xlu1 %v2709_v18, %s2475_s13 }
 0x347   : > { %v448_v43 = vpop.xlane.xlu1 %447 }
 0x348   : > { %v450_v44 = vsub.f32 %v440_v38, %v448_v43  ;;  %v445_v45 = vpop.xlane.xlu0 %444 }
 0x349   : > { %v449_v46 = vsub.f32 %v435_v40, %v445_v45 }
 0x34a   : > { %v453_v47 = vmul.f32 1.442695, %v450_v44 }
 0x34b   : > { %v451_v48 = vmul.f32 1.442695, %v449_v46  ;;  %v2173_v49 = vpop.permute.xlu1 %2172  ;;  %v2215_v46 = vld [vmem:[#allocation7 + $0xc4] ss:$8 sps:$4 sm:$0xff]  }
 0x34c   : > { %2247 = vpow2.f32 %v453_v47  ;;  %v2175_v50 = vunpack.i.h.bf16 %v2173_v49  ;;  %v2174_v51 = vunpack.i.l.bf16 %v2173_v49 }
 0x34d   : > { %2249 = vpow2.f32 %v451_v48 }
 0x34e   : > { %v2051_v52 = vpack.c.bf16 %v2175_v50, %v2174_v51 }
 0x34f   : > { %v548_v57 = vpop.permute.xlu1 %547 }
 0x350   : > { %2053 = vmatprep.subr.msk.bf16.mxu1 %vm2724_vm2, %v2051_v52 }
 0x356   : > { %v2248_v53 = vpop.eup %2247 }
 0x357   : > { %v458_v54 = vsel %vm359_vm1, %v2248_v53, 0.0  ;;  %v2250_v55 = vpop.eup %2249 }
 0x358   : > { %459 = vadd.xlane.f32.xlu1 %v458_v54  ;;  %v455_v56 = vsel %vm359_vm1, %v2250_v55, 0.0 }
 0x35c   : > { %456 = vadd.xlane.f32.xlu1 %v455_v56 }
 0x36d   : > { %549 = vrot.lane.b32.xlu1 %v2711_v21, %s2475_s13 }
 0x3e5   : > { %v460_v58 = vpop.xlane.xlu1 %459 }
 0x3e6   : > { %2251 = vrcp.f32 %v460_v58 }
 0x3e9   : > { %v457_v59 = vpop.xlane.xlu1 %456 }
 0x3ea   : > { %2253 = vrcp.f32 %v457_v59 }
 0x3ed   : > { %v550_v1 = vpop.permute.xlu1 %549 }
 0x3f0   : > { %v2252_v60 = vpop.eup %2251 }
 0x3f1   : > { %v464_v63 = vmul.f32 %v2252_v60, %v2248_v53 }
 0x3f4   : > { %v2254_v61 = vpop.eup %2253 }
 0x3f5   : > { %v463_v62 = vmul.f32 %v2254_v61, %v2250_v55 }
 0x3f7   : > { %1960 = vmatprep.mubr.msk.f32.mxu1 %vm359_vm1, %v463_v62 }
 0x3f8   : > { %1961 = vmatmul.mubr.msk.f32.vlgmr.msra.gmra.mrb[2].mxu1 %vm359_vm1, %v464_v63 }
 0x3f9   : > { %2056 = vmatpush3.bf16.xpose.msk.msra.mxu1 %vm2724_vm2, %v2051_v52  ;;  %1967 = vmatprep.mubr.msk.f32.mxu1 %vm359_vm1, %v548_v57 }
 0x3fa   : > { %1977 = vmatprep.subr.bf16.mxu1 %v2477_v30 }
 0x400   : > { %1968 = vmatmul.mubr.msk.f32.vlgmr.msra.gmra.mrb[4].mxu1 %vm359_vm1, %v550_v1 }
 0x401   : > { %1978 = vmatpush3.bf16.msra.mxu1 %v2214_v29  ;;  %1979 = vmatprep.mubr.msk.bf16.mxu1 %vm2479_vm4, %v2477_v30 }
 0x4cb   : > { %v2756_v2 = vpop.f32.mrb[2].mxu1 }
 0x4cc   : > { %v537_v3 = vpop.f32.mrb[3].mxu1 }
 0x4cd   : > { %v546_v4 = vpack.c.bf16 %v2756_v2, %v537_v3 }
 0x4d3   : > { %v1969_v5 = vpop.f32.mrb[4].mxu1 }
 0x4d4   : > { %v635_v6 = vadd.f32 %v1969_v5, %v2735_v36  ;;  %v629_v7 = vpop.f32.mrb[5].mxu1 }
 0x4d5   : > { %v630_v8 = vadd.f32 %v629_v7, %v2735_v36 }
 0x4d6   : > { %v641_v10 = vsel %vm359_vm1, %v635_v6, -inf }
 0x4d7   : > { %642 = vmax.xlane.f32.xlu1 %v641_v10  ;;  %v638_v13 = vsel %vm359_vm1, %v630_v8, -inf }
 0x4d8   : > { %639 = vmax.xlane.f32.xlu0 %v638_v13 }
 0x4e8   : > { %852 = vrot.lane.b32.xlu1 %v2711_v21, %s2476_s14 }
 0x564   : > { %v643_v15 = vpop.xlane.xlu1 %642 }
 0x565   : > { %v645_v16 = vsub.f32 %v635_v6, %v643_v15  ;;  %v640_v17 = vpop.xlane.xlu0 %639 }
 0x566   : > { %v644_v19 = vsub.f32 %v630_v8, %v640_v17 }
 0x567   : > { %v648_v20 = vmul.f32 1.442695, %v645_v16 }
 0x568   : > { %v646_v22 = vmul.f32 1.442695, %v644_v19  ;;  %v853_v56 = vpop.permute.xlu1 %852 }
 0x569   : > { %2255 = vpow2.f32 %v648_v20 }
 0x56a   : > { %2257 = vpow2.f32 %v646_v22 }
 0x573   : > { %v2256_v23 = vpop.eup %2255 }
 0x574   : > { %v653_v24 = vsel %vm359_vm1, %v2256_v23, 0.0  ;;  %v2258_v26 = vpop.eup %2257 }
 0x575   : > { %654 = vadd.xlane.f32.xlu0 %v653_v24  ;;  %v650_v28 = vsel %vm359_vm1, %v2258_v26, 0.0 }
 0x579   : > { %651 = vadd.xlane.f32.xlu0 %v650_v28 }
 0x58f   : > { %2177 = vrot.lane.b32.xlu0 %v2719_v27, %s2475_s13 }
 0x593   : > { %2182 = vrot.lane.b32.xlu0 %v2717_v25, %s2478_s8 }
 0x597   : > { %850 = vrot.lane.b32.xlu0 %v2709_v18, %s2476_s14 }
 0x602   : > { %v655_v32 = vpop.xlane.xlu0 %654 }
 0x603   : > { %2259 = vrcp.f32 %v655_v32 }
 0x606   : > { %v652_v33 = vpop.xlane.xlu0 %651 }
 0x607   : > { %2261 = vrcp.f32 %v652_v33 }
 0x60a   : > { %v2178_v34 = vpop.permute.xlu0 %2177 }
 0x60b   : > { %v2180_v35 = vunpack.i.h.bf16 %v2178_v34  ;;  %v2179_v37 = vunpack.i.l.bf16 %v2178_v34 }
 0x60d   : > { %v2057_v38 = vpack.c.bf16 %v2180_v35, %v2179_v37  ;;  %v2260_v42 = vpop.eup %2259 }
 0x60e   : > { %v2183_v39 = vpop.permute.xlu0 %2182  ;;  %v659_v47 = vmul.f32 %v2260_v42, %v2256_v23 }
 0x60f   : > { %v2185_v40 = vunpack.i.h.bf16 %v2183_v39  ;;  %v2184_v41 = vunpack.i.l.bf16 %v2183_v39  ;;  %2058 = vmatprep.subr.bf16.mxu0 %v2057_v38 }
 0x610   : > { %2060 = vmatpush3.bf16.msra.mxu0 %v2057_v38 }
 0x611   : > { %v2262_v43 = vpop.eup %2261  ;;  %v2061_v44 = vpack.c.bf16 %v2185_v40, %v2184_v41  ;;  %1983 = vmatprep.subr.bf16.mxu0 %v2477_v30 }
 0x612   : > { %v658_v45 = vmul.f32 %v2262_v43, %v2258_v26  ;;  %v851_v51 = vpop.permute.xlu0 %850 }
 0x613   : > { %2063 = vmatprep.subr.msk.bf16.mxu1 %vm2724_vm2, %v2061_v44 }
 0x614   : > { %1974 = vmatprep.mubr.msk.f32.mxu0 %vm359_vm1, %v658_v45 }
 0x615   : > { %1975 = vmatmul.mubr.msk.f32.vlgmr.msra.gmra.mrb[4].mxu0 %vm359_vm1, %v659_v47 }
 0x616   : > { %1984 = vmatpush3.bf16.msra.mxu0 %v2215_v46  ;;  %1985 = vmatprep.mubr.msk.bf16.mxu0 %vm2479_vm4, %v2477_v30 }
 0x619   : > { %1986 = vmatmul.mubr.msk.bf16.vlgmr.msra.gmra.mrb[8].mxu0 %vm359_vm1, %v546_v4 }
 0x6e8   : > { %v1976_v48 = vpop.f32.mrb[4].mxu0 }
 0x6e9   : > { %v740_v49 = vpop.f32.mrb[5].mxu0 }
 0x6ea   : > { %v749_v50 = vpack.c.bf16 %v1976_v48, %v740_v49 }
 0x6ec   : > { %1980 = vmatmul.mubr.msk.bf16.vlgmr.msra.gmra.mrb[8].mxu1 %vm359_vm1, %v749_v50  ;;  %v843_v52 = vpop.f32.mrb[8].mxu0 }
 0x6ed   : > { %2066 = vmatpush3.bf16.xpose.msk.msra.mxu1 %vm2724_vm2, %v2061_v44  ;;  %v1987_v53 = vpop.f32.mrb[9].mxu0  ;;  %1993 = vmatprep.mubr.msk.f32.mxu1 %vm359_vm1, %v851_v51 }
 0x6ee   : > { %v846_v54 = vpop.f32.mrb[10].mxu0  ;;  %2003 = vmatprep.subr.bf16.mxu1 %v2477_v30 }
 0x6ef   : > { %v1988_v55 = vpop.f32.mrb[11].mxu0 }
 0x6f4   : > { %1994 = vmatmul.mubr.msk.f32.vlgmr.msra.gmra.mrb[6].mxu1 %vm359_vm1, %v853_v56 }
 0x6f5   : > { %2005 = vmatprep.mubr.msk.bf16.mxu1 %vm2479_vm4, %v2477_v30 }
 0x7bf   : > { %v793_v57 = vpop.f32.mrb[8].mxu1 }
 0x7c0   : > { %v2791_v58 = vadd.f32 %v843_v52, %v793_v57  ;;  %v1981_v59 = vpop.f32.mrb[9].mxu1 }
 0x7c1   : > { %v796_v60 = vpop.f32.mrb[10].mxu1 }
 0x7c2   : > { %v2793_v61 = vadd.f32 %v846_v54, %v796_v60  ;;  %v1982_v62 = vpop.f32.mrb[11].mxu1 }
 0x7c7   : > { %v1995_v63 = vpop.f32.mrb[6].mxu1 }
 0x7c8   : > { %v938_v1 = vadd.f32 %v1995_v63, %v2735_v36  ;;  %v932_v2 = vpop.f32.mrb[7].mxu1 }
 0x7c9   : > { %v933_v3 = vadd.f32 %v932_v2, %v2735_v36 }
 0x7ca   : > { %v944_v4 = vsel %vm359_vm1, %v938_v1, -inf }
 0x7cb   : > { %945 = vmax.xlane.f32.xlu1 %v944_v4  ;;  %v941_v5 = vsel %vm359_vm1, %v933_v3, -inf }
 0x7cc   : > { %942 = vmax.xlane.f32.xlu0 %v941_v5 }
 0x7dc   : > { %2192 = vrot.lane.b32.xlu1 %v2717_v25, %s2480_s20 }
 0x7e2   : > { %2187 = vrot.lane.b32.xlu0 %v2719_v27, %s2476_s14 }
 0x858   : > { %v946_v6 = vpop.xlane.xlu1 %945 }
 0x859   : > { %v948_v7 = vsub.f32 %v938_v1, %v946_v6  ;;  %v943_v8 = vpop.xlane.xlu0 %942 }
 0x85a   : > { %v947_v10 = vsub.f32 %v933_v3, %v943_v8 }
 0x85b   : > { %v951_v13 = vmul.f32 1.442695, %v948_v7 }
 0x85c   : > { %v949_v15 = vmul.f32 1.442695, %v947_v10  ;;  %v2193_v16 = vpop.permute.xlu1 %2192 }
 0x85d   : > { %2263 = vpow2.f32 %v951_v13  ;;  %v2188_v17 = vpop.permute.xlu0 %2187  ;;  %v2195_v19 = vunpack.i.h.bf16 %v2193_v16  ;;  %v2194_v20 = vunpack.i.l.bf16 %v2193_v16 }
 0x85e   : > { %v2190_v22 = vunpack.i.h.bf16 %v2188_v17  ;;  %v2189_v23 = vunpack.i.l.bf16 %v2188_v17  ;;  %2265 = vpow2.f32 %v949_v15 }
 0x85f   : > { %v2071_v26 = vpack.c.bf16 %v2195_v19, %v2194_v20  ;;  %v1356_v20 = vld [vmem:[#allocation9 + $0x1] ss:$0 sm:$0xff] }
 0x860   : > { %v2067_v24 = vpack.c.bf16 %v2190_v22, %v2189_v23 }
 0x862   : > { %2068 = vmatprep.subr.bf16.mxu0 %v2067_v24 }
 0x863   : > { %2070 = vmatpush3.bf16.msra.mxu0 %v2067_v24  ;;  %v226_v24 = vunpack.c.l.bf16 %v2697_v9 }
 0x864   : > { %2073 = vmatprep.subr.msk.bf16.mxu0 %vm2724_vm2, %v2071_v26 }
 0x867   : > { %v2264_v25 = vpop.eup %2263 }
 0x868   : > { %v956_v28 = vsel %vm359_vm1, %v2264_v25, 0.0  ;;  %v2266_v29 = vpop.eup %2265 }
 0x869   : > { %957 = vadd.xlane.f32.xlu0 %v956_v28  ;;  %v953_v32 = vsel %vm359_vm1, %v2266_v29, 0.0 }
 0x86d   : > { %954 = vadd.xlane.f32.xlu0 %v953_v32  ;;  %v227_v32 = vunpack.c.h.bf16 %v2697_v9 }
 0x883   : > { %1103 = vrot.lane.b32.xlu0 %v2709_v18, %s2481_s21 }
 0x887   : > { %1105 = vrot.lane.b32.xlu0 %v2711_v21, %s2481_s21  ;;  %v2216_v21 = vld [vmem:[#allocation7 + $0xe4] ss:$8 sps:$4 sm:$0xff]  }
 0x888   : > { %2004 = vmatpush3.bf16.msra.mxu1 %v2216_v21 }
 0x8f6   : > { %v958_v33 = vpop.xlane.xlu0 %957 }
 0x8f7   : > { %2267 = vrcp.f32 %v958_v33 }
 0x8fa   : > { %v955_v34 = vpop.xlane.xlu0 %954 }
 0x8fb   : > { %2269 = vrcp.f32 %v955_v34 }
 0x8fe   : > { %v1104_v40 = vpop.permute.xlu0 %1103 }
 0x901   : > { %v2268_v35 = vpop.eup %2267 }
 0x902   : > { %v962_v39 = vmul.f32 %v2268_v35, %v2264_v25  ;;  %v1106_v18 = vpop.permute.xlu0 %1105 }
 0x905   : > { %v2270_v37 = vpop.eup %2269 }
 0x906   : > { %v961_v38 = vmul.f32 %v2270_v37, %v2266_v29 }
 0x908   : > { %2000 = vmatprep.mubr.msk.f32.mxu0 %vm359_vm1, %v961_v38 }
 0x909   : > { %2001 = vmatmul.mubr.msk.f32.vlgmr.msra.gmra.mrb[6].mxu0 %vm359_vm1, %v962_v39 }
 0x90a   : > { %2076 = vmatpush3.bf16.xpose.msk.msra.mxu0 %vm2724_vm2, %v2071_v26  ;;  %2013 = vmatprep.mubr.msk.f32.mxu0 %vm359_vm1, %v1104_v40 }
 0x90b   : > { %2023 = vmatprep.subr.bf16.mxu0 %v2477_v30 }
 0x911   : > { %2014 = vmatmul.mubr.msk.f32.vlgmr.msra.gmra.mrb[12].mxu0 %vm359_vm1, %v1106_v18 }
 0x912   : > { %2025 = vmatprep.mubr.msk.bf16.mxu0 %vm2479_vm4, %v2477_v30 }
 0x9dc   : > { %v2002_v41 = vpop.f32.mrb[6].mxu0 }
 0x9dd   : > { %v1041_v42 = vpop.f32.mrb[7].mxu0 }
 0x9de   : > { %v1050_v43 = vpack.c.bf16 %v2002_v41, %v1041_v42 }
 0x9e0   : > { %2006 = vmatmul.mubr.msk.bf16.vlgmr.msra.gmra.mrb[12].mxu1 %vm359_vm1, %v1050_v43 }
 0x9e4   : > { %v2015_v44 = vpop.f32.mrb[12].mxu0 }
 0x9e5   : > { %v1191_v31 = vadd.f32 %v2015_v44, %v2735_v36  ;;  %v1185_v45 = vpop.f32.mrb[13].mxu0 }
 0x9e6   : > { %v1186_v46 = vadd.f32 %v1185_v45, %v2735_v36  ;;  %v2218_v45 = vld [vmem:[#allocation7 + $0x40] ss:$8 sps:$4 sm:$0xff]  }
 0x9e7   : > { %v1197_v47 = vsel %vm359_vm1, %v1191_v31, -inf }
 0x9e8   : > { %1198 = vmax.xlane.f32.xlu0 %v1197_v47  ;;  %v1194_v48 = vsel %vm359_vm1, %v1186_v46, -inf  ;;  %v2221_v47 = vld [vmem:[#allocation7 + $0x50] ss:$8 sps:$4 sm:$0xff]  }
 0x9e9   : > { %1195 = vmax.xlane.f32.xlu1 %v1194_v48  ;;  %v2226_v48 = vld [vmem:[#allocation7 + $0x64] ss:$8 sps:$4 sm:$0xff]  }
 0xa75   : > { %v1199_v49 = vpop.xlane.xlu0 %1198 }
 0xa76   : > { %v1201_v50 = vsub.f32 %v1191_v31, %v1199_v49  ;;  %v1196_v51 = vpop.xlane.xlu1 %1195  ;;  %v2220_v31 = vld [vmem:[#allocation7 + $0x44] ss:$8 sps:$4 sm:$0xff]   ;;  %v2224_v49 = vld [vmem:[#allocation7 + $0x60] ss:$8 sps:$4 sm:$0xff]  }
 0xa77   : > { %v1200_v52 = vsub.f32 %v1186_v46, %v1196_v51  ;;  %v2223_v46 = vld [vmem:[#allocation7 + $0x54] ss:$8 sps:$4 sm:$0xff]  }
 0xa78   : > { %v1204_v53 = vmul.f32 1.442695, %v1201_v50  ;;  %v2227_v50 = vld [vmem:[#allocation7 + $0x70] ss:$8 sps:$4 sm:$0xff]   ;;  %v2229_v51 = vld [vmem:[#allocation7 + $0x74] ss:$8 sps:$4 sm:$0xff]  }
 0xa79   : > { %v1202_v54 = vmul.f32 1.442695, %v1200_v52  ;;  %v2230_v52 = vld [vmem:[#allocation7 + $0x80] ss:$8 sps:$4 sm:$0xff]  }
 0xa7a   : > { %2271 = vpow2.f32 %v1204_v53  ;;  %v2232_v53 = vld [vmem:[#allocation7 + $0x84] ss:$8 sps:$4 sm:$0xff]  }
 0xa7b   : > { %2273 = vpow2.f32 %v1202_v54  ;;  %v2235_v54 = vld [vmem:[#allocation7 + $0x94] ss:$8 sps:$4 sm:$0xff]  }
 0xa84   : > { %v2272_v55 = vpop.eup %2271 }
 0xa85   : > { %v2274_v56 = vpop.eup %2273  ;;  %v1209_v57 = vsel %vm359_vm1, %v2272_v55, 0.0 }
 0xa86   : > { %1210 = vadd.xlane.f32.xlu1 %v1209_v57  ;;  %v1206_v36 = vsel %vm359_vm1, %v2274_v56, 0.0  ;;  %v2236_v57 = vld [vmem:[#allocation7 + $0xa0] ss:$8 sps:$4 sm:$0xff]  }
 0xa87   : > { %1207 = vadd.xlane.f32.xlu0 %v1206_v36 }
 0xa9d   : > { %2197 = vrot.lane.b32.xlu0 %v2719_v27, %s2481_s21 }
 0xab3   : > { %v1094_v59 = vpop.f32.mrb[12].mxu1 }
 0xab4   : > { %v1101_v60 = vadd.f32 %v1094_v59, %v2791_v58  ;;  %v2007_v62 = vpop.f32.mrb[13].mxu1  ;;  %v2217_v58 = vld [vmem:[#allocation7 + $0xf4] ss:$8 sps:$4 sm:$0xff]  }
 0xab5   : > { %v1097_v63 = vpop.f32.mrb[14].mxu1  ;;  %2024 = vmatpush3.bf16.msra.mxu0 %v2217_v58  ;;  %v2241_v58 = vld [vmem:[#allocation7 + $0xb4] ss:$8 sps:$4 sm:$0xff]  }
 0xab6   : > { %v1102_v1 = vadd.f32 %v1097_v63, %v2793_v61  ;;  %v2008_v2 = vpop.f32.mrb[15].mxu1  ;;  %1557 = vmatprep.subr.bf16.mxu0 %v2232_v53  ;;  %v2243_v53 = vld [vmem:[#allocation7 + $0xd0] ss:$8 sps:$4 sm:$0xff]  }
 0xb13   : > { %v1211_v3 = vpop.xlane.xlu1 %1210 }
 0xb14   : > { %2275 = vrcp.f32 %v1211_v3  ;;  %v1208_v4 = vpop.xlane.xlu0 %1207 }
 0xb15   : > { %2277 = vrcp.f32 %v1208_v4  ;;  %v1382_v4 = vld [vmem:[#allocation9 + $0x2] ss:$0 sm:$0xff] }
 0xb18   : > { %v2198_v5 = vpop.permute.xlu0 %2197 }
 0xb19   : > { %v2200_v6 = vunpack.i.h.bf16 %v2198_v5  ;;  %v2199_v7 = vunpack.i.l.bf16 %v2198_v5 }
 0xb1b   : > { %v2077_v8 = vpack.c.bf16 %v2200_v6, %v2199_v7 }
 0xb1d   : > { %2078 = vmatprep.subr.bf16.mxu1 %v2077_v8 }
 0xb1e   : > { %v2276_v10 = vpop.eup %2275  ;;  %2080 = vmatpush3.bf16.msra.mxu1 %v2077_v8  ;;  %v1383_v8 = vld [vmem:[#allocation9 + $0x3] ss:$0 sm:$0xff] }
 0xb1f   : > { %v2278_v27 = vpop.eup %2277  ;;  %v1215_v15 = vmul.f32 %v2276_v10, %v2272_v55  ;;  %1459 = vmatprep.subr.bf16.mxu1 %v2220_v31  ;;  %v2233_v55 = vld [vmem:[#allocation7 + $0x90] ss:$8 sps:$4 sm:$0xff]  }
 0xb20   : > { %v1214_v13 = vmul.f32 %v2278_v27, %v2274_v56  ;;  %v2238_v56 = vld [vmem:[#allocation7 + $0xa4] ss:$8 sps:$4 sm:$0xff]  }
 0xb22   : > { %2020 = vmatprep.mubr.msk.f32.mxu1 %vm359_vm1, %v1214_v13 }
 0xb23   : > { %2021 = vmatmul.mubr.msk.f32.vlgmr.msra.gmra.mrb[16].mxu1 %vm359_vm1, %v1215_v15 }
 0xb24   : > { %1491 = vmatprep.mubr.bf16.mxu1 %v2471_v0  ;;  %1460 = vmatpush1.bf16.msra.mxu1 %v2218_v45 }
 0xb25   : > { %1461 = vmatprep.subr.bf16.mxu1 %v2223_v46 }
 0xb28   : > { %1462 = vmatpush1.bf16.msra.mxu1 %v2221_v47 }
 0xb29   : > { %1463 = vmatprep.subr.bf16.mxu1 %v2226_v48 }
 0xb2c   : > { %1464 = vmatpush1.bf16.msra.mxu1 %v2224_v49 }
 0xb2d   : > { %1465 = vmatprep.subr.bf16.mxu1 %v2229_v51 }
 0xb30   : > { %1466 = vmatpush1.bf16.msra.mxu1 %v2227_v50 }
 0xb31   : > { %2029 = vmatprep.subr.bf16.mxu1 %v2477_v30 }
 0xbf6   : > { %v2022_v61 = vpop.f32.mrb[16].mxu1 }
 0xbf7   : > { %v1294_v16 = vpop.f32.mrb[17].mxu1 }
 0xbf8   : > { %v1303_v17 = vpack.c.bf16 %v2022_v61, %v1294_v16  ;;  %v2239_v61 = vld [vmem:[#allocation7 + $0xb0] ss:$8 sps:$4 sm:$0xff]   ;;  %v1403_v16 = vld [vmem:[#allocation9 + $0x4] ss:$8 sm:$0x3] }
 0xbfa   : > { %2026 = vmatmul.mubr.msk.bf16.vlgmr.msra.gmra.mrb[16].mxu0 %vm359_vm1, %v1303_v17  ;;  %v1409_v17 = vrot.slane %v1403_v16, %v245_v12  ;;  %v1514_v12 = vld [vmem:[#allocation9 + $0x5] ss:$0 sm:$0xff] }
 0xbfb   : > { %1558 = vmatpush1.bf16.xpose.msra.mxu0 %v2230_v52  ;;  %v2242_v52 = vld [vmem:[#allocation7 + $0xc0] ss:$8 sps:$4 sm:$0xff]  }
 0xbfc   : > { %1559 = vmatprep.subr.bf16.mxu0 %v2235_v54  ;;  %v2244_v54 = vld [vmem:[#allocation7 + $0xe0] ss:$8 sps:$4 sm:$0xff]  }
 0xc03   : > { %1560 = vmatpush1.bf16.xpose.msra.mxu0 %v2233_v55  ;;  %v2245_v55 = vld [vmem:[#allocation7 + $0xf0] ss:$8 sps:$4 sm:$0xff]  }
 0xc04   : > { %1561 = vmatprep.subr.bf16.mxu0 %v2238_v56 }
 0xc0b   : > { %1562 = vmatpush1.bf16.xpose.msra.mxu0 %v2236_v57 }
 0xc0c   : > { %1563 = vmatprep.subr.bf16.mxu0 %v2241_v58 }
 0xc13   : > { %1564 = vmatpush1.bf16.xpose.msra.mxu0 %v2239_v61 }
 0xccd   : > { %v1347_v19 = vpop.f32.mrb[16].mxu0 }
 0xcce   : > { %v1354_v22 = vadd.f32 %v1347_v19, %v1101_v60  ;;  %v2027_v23 = vpop.f32.mrb[17].mxu0  ;;  %v1413_v19 = vrot.slane %v1403_v16, %v249_v14 }
 0xccf   : > { %v1350_v26 = vpop.f32.mrb[18].mxu0 }
 0xcd0   : > { %v1357_v25 = vadd.f32 %v1356_v20, %v1354_v22  ;;  %v1355_v28 = vadd.f32 %v1350_v26, %v1102_v1  ;;  %v2028_v29 = vpop.f32.mrb[19].mxu0 }
 0xcd2   : > { %v1358_v0 = vadd.f32 %v1356_v20, %v1355_v28  ;;  %v1359_v33 = vadd.f32 %v1357_v25, %v226_v24 }
 0xcd4   : > { %v1361_v34 = vsel %vm298_vm0, %v1359_v33, 0.0  ;;  %v1360_v35 = vadd.f32 %v1358_v0, %v227_v32 }
 0xcd5   : > { %1362 = vadd.xlane.f32.xlu1 %v1361_v34 }
 0xcd6   : > { %v1364_v37 = vsel %vm298_vm0, %v1360_v35, 0.0 }
 0xcd9   : > { %1365 = vadd.xlane.f32.xlu1 %v1364_v37 }
 0xd62   : > { %v1363_v38 = vpop.xlane.xlu1 %1362 }
 0xd63   : > { %v1368_v39 = vmul.f32 0.015625, %v1363_v38 }
 0xd65   : > { %v1370_v40 = vsub.f32 %v1359_v33, %v1368_v39 }
 0xd66   : > { %v1366_v18 = vpop.xlane.xlu1 %1365 }
 0xd67   : > { %v1369_v21 = vmul.f32 0.015625, %v1366_v18  ;;  %v1372_v41 = vmul.f32 %v1370_v40, %v1370_v40 }
 0xd69   : > { %v1371_v42 = vsub.f32 %v1360_v35, %v1369_v21  ;;  %v1374_v43 = vsel %vm298_vm0, %v1372_v41, 0.0 }
 0xd6a   : > { %1375 = vadd.xlane.f32.xlu1 %v1374_v43 }
 0xd6b   : > { %v1373_v9 = vmul.f32 %v1371_v42, %v1371_v42 }
 0xd6d   : > { %v1377_v44 = vsel %vm298_vm0, %v1373_v9, 0.0 }
 0xd6e   : > { %1378 = vadd.xlane.f32.xlu1 %v1377_v44 }
 0xdf7   : > { %v1376_v36 = vpop.xlane.xlu1 %1375 }
 0xdf8   : > { %v1380_v59 = vmul.f32 0.015625, %v1376_v36 }
 0xdfa   : > { %v1384_v60 = vadd.f32 1e-05, %v1380_v59 }
 0xdfb   : > { %v1379_v62 = vpop.xlane.xlu1 %1378 }
 0xdfc   : > { %2279 = vrsqrt.f32 %v1384_v60  ;;  %v1381_v63 = vmul.f32 0.015625, %v1379_v62 }
 0xdfe   : > { %v1385_v1 = vadd.f32 1e-05, %v1381_v63 }
 0xe00   : > { %2281 = vrsqrt.f32 %v1385_v1  ;;  %v1620_v1 = vld [vmem:[#allocation9 + $0x6] ss:$0 sm:$0xff] }
 0xe06   : > { %v2280_v2 = vpop.eup %2279 }
 0xe07   : > { %v1388_v3 = vmul.f32 %v2280_v2, %v1370_v40 }
 0xe09   : > { %v1390_v6 = vmul.f32 %v1388_v3, %v1382_v4 }
 0xe0a   : > { %v2282_v5 = vpop.eup %2281 }
 0xe0b   : > { %v1389_v7 = vmul.f32 %v2282_v5, %v1371_v42  ;;  %v1392_v27 = vadd.f32 %v1390_v6, %v1383_v8  ;;  %v1621_v5 = vld [vmem:[#allocation9 + $0x7] ss:$0 sm:$0xff] }
 0xe0d   : > { %v1391_v10 = vmul.f32 %v1389_v7, %v1382_v4 }
 0xe0f   : > { %v1393_v13 = vadd.f32 %v1391_v10, %v1383_v8 }
 0xe11   : > { %v1404_v15 = vpack.c.bf16 %v1393_v13, %v1392_v27 }
 0xe13   : > { %1885 = vmatmul.mubr.msk.bf16.vlgmr.msra.gmra.mrb[20].mxu1 %vm298_vm0, %v1404_v15 }
 0xe14   : > { %2037 = vmatprep.mubr.msk.bf16.mxu1 %vm2479_vm4, %v2477_v30  ;;  %2030 = vmatpush3.bf16.msra.mxu1 %v2242_v52 }
 0xe15   : > { %2031 = vmatprep.subr.bf16.mxu1 %v2477_v30 }
 0xe18   : > { %2032 = vmatpush3.bf16.msra.mxu1 %v2243_v53 }
 0xe19   : > { %2033 = vmatprep.subr.bf16.mxu1 %v2477_v30 }
 0xe1c   : > { %2034 = vmatpush3.bf16.msra.mxu1 %v2244_v54 }
 0xe1d   : > { %2035 = vmatprep.subr.bf16.mxu1 %v2477_v30 }
 0xe20   : > { %2036 = vmatpush3.bf16.msra.mxu1 %v2245_v55 }
 0xee6   : > { %v1493_v20 = vpop.f32.mrb[20].mxu1 }
 0xee7   : > { %v1494_v22 = vadd.f32 %v1493_v20, %v1409_v17  ;;  %v1495_v23 = vpop.f32.mrb[21].mxu1 }
 0xee8   : > { %v1496_v24 = vadd.f32 %v1495_v23, %v1413_v19  ;;  %v1497_v26 = vpop.f32.mrb[22].mxu1 }
 0xee9   : > { %v1498_v25 = vadd.f32 %v1497_v26, %v1409_v17  ;;  %v1499_v28 = vpop.f32.mrb[23].mxu1  ;;  %v1502_v32 = vmax.f32 %v1494_v22, 0.0  ;;  %v1649_v22 = vld [vmem:[#allocation9 + $0x10] ss:$0 sm:$0xff] }
 0xeea   : > { %v1500_v29 = vadd.f32 %v1499_v28, %v1413_v19  ;;  %v1503_v33 = vmax.f32 %v1496_v24, 0.0 }
 0xeeb   : > { %v1504_v0 = vmax.f32 %v1498_v25, 0.0 }
 0xeec   : > { %v1505_v34 = vmax.f32 %v1500_v29, 0.0 }
 0xeed   : > { %v1515_v35 = vpack.c.bf16 %v1504_v0, %v1502_v32 }
 0xeee   : > { %v1516_v37 = vpack.c.bf16 %v1505_v34, %v1503_v33 }
 0xef0   : > { %1589 = vmatprep.mubr.bf16.mxu0 %v1516_v37 }
 0xef1   : > { %1590 = vmatmul.mubr.bf16.vlgmr.msra.gmra.mrb[20].mxu0 %v1515_v35 }
 0xfc4   : > { %v1591_v38 = vpop.f32.mrb[20].mxu0 }
 0xfc5   : > { %v1592_v11 = vadd.f32 %v1591_v38, %v1514_v12  ;;  %v1593_v14 = vpop.f32.mrb[21].mxu0 }
 0xfc6   : > { %v1594_v39 = vpop.f32.mrb[22].mxu0 }
 0xfc7   : > { %v1595_v40 = vadd.f32 %v1594_v39, %v1514_v12  ;;  %v1596_v18 = vpop.f32.mrb[23].mxu0  ;;  %v1598_v21 = vadd.f32 %v1592_v11, %v1392_v27 }
 0xfc9   : > { %v1600_v41 = vsel %vm298_vm0, %v1598_v21, 0.0  ;;  %v1599_v42 = vadd.f32 %v1595_v40, %v1393_v13 }
 0xfca   : > { %1601 = vadd.xlane.f32.xlu1 %v1600_v41 }
 0xfcb   : > { %v1603_v43 = vsel %vm298_vm0, %v1599_v42, 0.0 }
 0xfcc   : > { %1604 = vadd.xlane.f32.xlu0 %v1603_v43 }
0x1057   : > { %v1602_v9 = vpop.xlane.xlu1 %1601 }
0x1058   : > { %v1606_v44 = vmul.f32 0.015625, %v1602_v9 }
0x1059   : > { %v1605_v31 = vpop.xlane.xlu0 %1604 }
0x105a   : > { %v1608_v45 = vsub.f32 %v1598_v21, %v1606_v44  ;;  %v1607_v46 = vmul.f32 0.015625, %v1605_v31 }
0x105c   : > { %v1609_v47 = vsub.f32 %v1599_v42, %v1607_v46  ;;  %v1610_v48 = vmul.f32 %v1608_v45, %v1608_v45 }
0x105e   : > { %v1612_v49 = vsel %vm298_vm0, %v1610_v48, 0.0  ;;  %v1611_v50 = vmul.f32 %v1609_v47, %v1609_v47 }
0x105f   : > { %1613 = vadd.xlane.f32.xlu1 %v1612_v49 }
0x1060   : > { %v1615_v51 = vsel %vm298_vm0, %v1611_v50, 0.0 }
0x1063   : > { %1616 = vadd.xlane.f32.xlu1 %v1615_v51 }
0x10ec   : > { %v1614_v56 = vpop.xlane.xlu1 %1613 }
0x10ed   : > { %v1618_v57 = vmul.f32 0.015625, %v1614_v56 }
0x10ef   : > { %v1622_v36 = vadd.f32 1e-05, %v1618_v57 }
0x10f0   : > { %v1617_v59 = vpop.xlane.xlu1 %1616 }
0x10f1   : > { %2283 = vrsqrt.f32 %v1622_v36  ;;  %v1619_v60 = vmul.f32 0.015625, %v1617_v59 }
0x10f3   : > { %v1623_v62 = vadd.f32 1e-05, %v1619_v60 }
0x10f5   : > { %2285 = vrsqrt.f32 %v1623_v62 }
0x10fb   : > { %v2284_v63 = vpop.eup %2283 }
0x10fc   : > { %v1626_v2 = vmul.f32 %v2284_v63, %v1608_v45 }
0x10fe   : > { %v1628_v3 = vmul.f32 %v1626_v2, %v1620_v1 }
0x10ff   : > { %v2286_v4 = vpop.eup %2285 }
0x1100   : > { %v1627_v6 = vmul.f32 %v2286_v4, %v1609_v47  ;;  %v1630_v7 = vadd.f32 %v1628_v3, %v1621_v5 }
0x1102   : > { %v1629_v8 = vmul.f32 %v1627_v6, %v1620_v1  ;;  %v1632_v30 = vsel %vm298_vm0, %v1630_v7, -inf }
0x1104   : > { %v1631_v10 = vadd.f32 %v1629_v8, %v1621_v5 }
0x1106   : > { %v1633_v27 = vsel %vm298_vm0, %v1631_v10, -inf }
0x1107   : > { %v1634_v13 = vmax.f32 %v1632_v30, %v1633_v27 }
0x1109   : > { %v1635_v15 = vrot.slane %v1634_v13, 4 }
0x110b   : > { %v1636_v58 = vmax.f32 %v1634_v13, %v1635_v15 }
0x110d   : > { %v1637_v61 = vrot.slane %v1636_v58, 2 }
0x110f   : > { %v1638_v16 = vmax.f32 %v1636_v58, %v1637_v61 }
0x1111   : > { %v1639_v17 = vrot.slane %v1638_v16, 1 }
0x1113   : > { %v1640_v19 = vmax.f32 %v1638_v16, %v1639_v17 }
0x1115   : > { %v1650_v20 = vpack.c.bf16 %v1640_v19, %v1640_v19 }
0x1117   : > { %2038 = vmatmul.mubr.msk.bf16.vlgmr.msra.gmra.mrb[24].mxu1 %vm298_vm0, %v1650_v20 }
0x11ea   : > { %v1712_v23 = vpop.f32.mrb[24].mxu1 }
0x11eb   : > { %v1713_v24 = vadd.f32 %v1712_v23, %v1649_v22  ;;  %v2039_v26 = vpop.f32.mrb[25].mxu1 }
0x11ec   : > { %v1715_v25 = vpop.f32.mrb[26].mxu1 }
0x11ed   : > { %v1899_v28 = vmul.f32 -1.442695, %v1713_v24  ;;  %v2040_v29 = vpop.f32.mrb[27].mxu1 }
0x11ef   : > { %2287 = vpow2.f32 %v1899_v28 }
0x11f9   : > { %v2288_v32 = vpop.eup %2287 }
0x11fa   : > { %v1721_v0 = vadd.f32 1.0, %v2288_v32 }
0x11fc   : > { %2289 = vrcp.f32 %v1721_v0 }
0x1206   : > { %v2290_v33 = vpop.eup %2289 }
0x1207   : > { %1724 = vst [vmem:[%s221_s24] sm:$0x1] %v2290_v33 }
0x1208   : > { %2400 = shalt.err (!%p2397_p10)
}
0x1209   : > { %s2401_s15 = scalar_lea.hbm %s2863_s12, 16  ;;  %s2405_s13 = scalar_lea.hbm %s2910_s4, 64 }
0x120a   : > { %p2402_p12 = scmp.ne.s32.totalorder %s2863_s12, %s2401_s15  ;;  %p2406_p8 = scmp.lt.u32.totalorder %s2863_s12, %s2910_s4 }
0x120b   : > { %p2407_p0 = scmp.lt.u32.totalorder %s2405_s13, %s2401_s15  ;;  %p2409_p4 = scmp.lt.u32.totalorder %s2401_s15, %s2863_s12 }
0x120c   : > { %p2403_p1 = pnand %p2402_p12, %p2635_p9 }
0x120d   : > { %p2408_p13 = por %p2407_p0, %p2406_p8 }
0x120e   : > { %p2404_p3 = pneg %p2403_p1 }
0x120f   : > { %p2410_p5 = por %p2409_p4, %p2408_p13 }
0x1211   : > { %p2411_p7 = pnand %p2410_p5, %p2404_p3 }
0x1213   : > { %2414 = shalt.err (!%p2411_p7)
}
0x1214   : > { %2091 = dma.vmem_to_hbm [thread:$0]  (%p2635_p9), %s2865_s11, 16, %s2863_s12, %s1726_s16  }
0x1215 PF: > { %p2113_p11 = scmp.ge.s32.totalorder %s2459_s28, 2  ;;  %s1750_s20 = sand.u32 1, %s2447_s25  }
0x1216   : > { %p2927_p2 = scmp.ne.s32.totalorder %s2915_s5, 0  ;;  %s1751_s21 = scalar_lea.sflag [#allocation6], %s1750_s20 }
0x1218   : > { %p2105_p6 = pnand %p2113_p11, %p2927_p2 }
0x121a   : > { %2442 = dma.done.wait (!%p2105_p6), %s1751_s21, 16  }
0x121b   : > { %2444 = vsyncadd (!%p2105_p6), %s1751_s21, 4294967280  ;;  %p22_p10 = scmp.ge.s32.totalorder %s2622_s19, 6   ;;  %s2928_s25 = smov %s2451_s26 }
0x121c   : > { %s2929_s26 = smov %s2455_s27  ;;  %s2930_s27 = smov %s2631_s22 }
0x121d   : > { %s2931_s28 = smov %s2622_s19  ;;  %24 = sbr.rel (!%p22_p10) target bundleno = 18 (0x12), region = 86 }
0x1224   :  { %1755 = vsyncpa [#allocation5], 1 }
0x1225   :  { %1757 = vsyncpa [#allocation5 + $0x1], 1 }
0x1226   :  { %1758 = vsyncpa [#allocation8], 1 }
0x1227   :  { %1759 = vsyncpa [#allocation6], 1 }
0x1228   :  { %1761 = vsyncpa [#allocation6 + $0x1], 1 }

</bundles_post_ra>
